<compile_context>
chip_gen: v7x
topology: tpu7x:2x2x1
jax: 0.10.0
libtpu: 0.0.40
codegen_flags: <defaults>
</compile_context>

<pallas_src>
import functools

import jax
import jax.numpy as jnp
import numpy as np
from jax.experimental import pallas as pl
from jax.experimental.pallas import tpu as pltpu

EPS = 1e-5

LOCAL_DIM = 8
VOXEL_DIM = 8
NUM_CLASSES = 8
HID = 32
REPEAT = 2
N_GCONV = 2 * REPEAT
IN_DIM = LOCAL_DIM + VOXEL_DIM + NUM_CLASSES  # 24

# ---- packed-slab layout ----
W_W1, W_W2, W_GCONV = 0, 1, 2
W_DEC = W_GCONV + N_GCONV          # 6..8 : decoder Linear 1..3
NUM_W = W_DEC + 3                  # 9    -> w_slab: (NUM_W, 2*HID, HID)

VEC_B1, VEC_B2, VEC_GCONV = 0, 1, 2            # 4 rows per gconv layer: b_rel, gn_w, gn_b, gn_alpha
VEC_DEC_B = VEC_GCONV + 4 * N_GCONV            # 18..20: decoder biases 1..3
VEC_DB4 = VEC_DEC_B + 3                        # 21
VEC_DW4T = VEC_DB4 + 1                         # 22
NUM_VEC = VEC_DW4T + 1                         # 23   -> vec_slab: (NUM_VEC, HID)


# ----------------------------- fused kernel -----------------------------

def _make_kernel(num_types):
    T = num_types
    f32 = jnp.float32

    def kernel(local_ref, voxel_ref, edge_ref, w_ref, vec_ref, o_ref, xcat_ref):
        local = local_ref[...]   # (Nl, LOCAL_DIM+1)              [local_x | local_type]
        voxel = voxel_ref[...]   # (Nv, VOXEL_DIM+NUM_CLASSES+1)  [voxel_x | label | voxel_type]
        edges = edge_ref[...]    # (E, 2)                         [src | dst]
        vecs = vec_ref[...]      # (NUM_VEC, HID)

        n_local, n_voxel = local.shape[0], voxel.shape[0]

        lx = local[:, :LOCAL_DIM]
        ltype = local[:, LOCAL_DIM:LOCAL_DIM + 1]
        vx_label = voxel[:, :VOXEL_DIM + NUM_CLASSES]
        vtype = voxel[:, VOXEL_DIM + NUM_CLASSES:VOXEL_DIM + NUM_CLASSES + 1]
        src = edges[:, 0:1]
        dst = edges[:, 1:2]

        def one_hot(col, width):
            iota = jax.lax.broadcasted_iota(jnp.int32, (col.shape[0], width), 1).astype(f32)
            return jnp.where(iota == col, 1.0, 0.0).astype(f32)

        # ---- one-hots + dense adjacency built in-kernel (VPU compares + one MXU matmul) ----
        oh_local = one_hot(ltype, T)                         # (Nl, T)
        oh_voxel = one_hot(vtype, T)                         # (Nv, T)
        oh_src = one_hot(src, n_voxel)                       # (E, Nv)
        oh_dst = one_hot(dst, n_voxel)                       # (E, Nv)
        adj = jax.lax.dot_general(oh_dst, oh_src, (((0,), (0,)), ((), ())),
                                  preferred_element_type=f32)          # (Nv, Nv): A[dst, src]

        # ---- type-matched local means broadcast to voxel nodes ----
        sums = jax.lax.dot_general(oh_local, lx, (((0,), (0,)), ((), ())),
                                   preferred_element_type=f32)         # (T, L) per-type sums
        counts = jax.lax.dot_general(oh_local, jnp.ones((n_local, 1), f32),
                                     (((0,), (0,)), ((), ())),
                                     preferred_element_type=f32)       # (T, 1) per-type counts
        means = jnp.where(counts > 0.0, sums / jnp.maximum(counts, 1.0), 0.0)
        matched = jnp.dot(oh_voxel, means, preferred_element_type=f32)  # (Nv, L)

        # ---- mlp_encoder: single W1 matmul over [matched | voxel_x | label] (scratch-assembled) ----
        xcat_ref[:, 0:LOCAL_DIM] = matched
        xcat_ref[:, LOCAL_DIM:IN_DIM] = vx_label
        x_in = xcat_ref[:, 0:IN_DIM]                                    # (Nv, 24)
        b1 = vecs[VEC_B1:VEC_B1 + 1, :]
        b2 = vecs[VEC_B2:VEC_B2 + 1, :]
        h = jnp.dot(x_in, w_ref[W_W1, :IN_DIM, :], preferred_element_type=f32) + b1
        h = jnp.maximum(h, 0.0)
        x = jnp.maximum(jnp.dot(h, w_ref[W_W2, :HID, :], preferred_element_type=f32) + b2, 0.0)

        # ---- encoder: 4 x (GraphConv -> GraphNorm -> ReLU)  (Dropout = identity, eval) ----
        ones_row = jnp.ones((1, n_voxel), f32)
        inv_n = 1.0 / n_voxel
        for li in range(N_GCONV):
            base = VEC_GCONV + 4 * li
            b_rel = vecs[base + 0:base + 1, :]
            gn_w = vecs[base + 1:base + 2, :]
            gn_b = vecs[base + 2:base + 3, :]
            gn_a = vecs[base + 3:base + 4, :]

            agg = jnp.dot(adj, x, preferred_element_type=f32)           # sum_j A[i,j] x_j
            # fused GraphConv: [x | A@x] @ [w_root ; w_rel]  -> one MXU op instead of two
            xcat_ref[:, 0:HID] = x
            xcat_ref[:, HID:2 * HID] = agg
            hconv = jnp.dot(xcat_ref[...], w_ref[W_GCONV + li],
                            preferred_element_type=f32) + b_rel          # (Nv, HID)

            # GraphNorm (single graph): two-pass stats, column sums on the MXU, rsqrt on EUP.
            mean = jnp.dot(ones_row, hconv, preferred_element_type=f32) * inv_n
            centered = hconv - mean * gn_a
            var = jnp.dot(ones_row, centered * centered, preferred_element_type=f32) * inv_n
            scale = gn_w * jax.lax.rsqrt(var + EPS)
            x = jnp.maximum(centered * scale + gn_b, 0.0)

        # ---- decoder: 3 x (Linear -> ReLU) then Linear -> Sigmoid, lane-dense (1, Nv) output ----
        for di in range(3):
            b = vecs[VEC_DEC_B + di:VEC_DEC_B + di + 1, :]
            x = jnp.maximum(jnp.dot(x, w_ref[W_DEC + di, :HID, :],
                                    preferred_element_type=f32) + b, 0.0)
        dw4t = vecs[VEC_DW4T:VEC_DW4T + 1, :]                            # (1, HID), first 4 valid
        db4 = vecs[VEC_DB4:VEC_DB4 + 1, 0:1]                             # (1, 1)
        logits = jax.lax.dot_general(dw4t, x, (((1,), (1,)), ((), ())),
                                     preferred_element_type=f32) + db4   # (1, Nv)
        o_ref[...] = jax.nn.sigmoid(logits)

    return kernel


# ------------------------- parameters (synthetic) -------------------------

def init_params(key):
    keys = iter(jax.random.split(key, 64))

    def lin(cin, cout):
        w = 0.1 * jax.random.normal(next(keys), (cin, cout), jnp.float32)
        b = 0.1 * jax.random.normal(next(keys), (1, cout), jnp.float32)
        return w, b

    params = {}
    w1, b1 = lin(IN_DIM, HID)
    w2, b2 = lin(HID, HID)
    params["mlp"] = (w1, b1, w2, b2)

    dims = []
    c = HID
    for _ in range(REPEAT):
        dims.append((c, c // 2)); c //= 2
    for _ in range(REPEAT):
        dims.append((c, c * 2)); c *= 2
    gconv = []
    for cin, cout in dims:
        w_rel, b_rel = lin(cin, cout)
        w_root = 0.1 * jax.random.normal(next(keys), (cin, cout), jnp.float32)
        gconv.append(dict(
            w_root=w_root, w_rel=w_rel, b_rel=b_rel,
            gn_w=jnp.ones((1, cout), jnp.float32),
            gn_b=jnp.zeros((1, cout), jnp.float32),
            gn_alpha=jnp.ones((1, cout), jnp.float32)))
    params["gconv"] = gconv

    d1 = lin(HID, HID // 2)
    d2 = lin(HID // 2, HID // 4)
    d3 = lin(HID // 4, HID // 8)
    d4 = lin(HID // 8, 1)
    params["dec"] = (*d1, *d2, *d3, *d4)
    return params


def pack_params(params):
    """One-time packing of every weight into two zero-padded slabs (numpy, OUTSIDE the jit).

    Zero padding keeps every intermediate at a fixed (Nv, HID) width; padded channels stay
    exactly zero through GraphConv / GraphNorm / ReLU / decoder (weights, biases, gn params
    are all zero there), so the kernel can use one constant-shape matmul per layer.
    """
    w_slab = np.zeros((NUM_W, 2 * HID, HID), np.float32)
    vec_slab = np.zeros((NUM_VEC, HID), np.float32)

    w1, b1, w2, b2 = params["mlp"]
    w_slab[W_W1, :IN_DIM, :] = np.asarray(w1)
    w_slab[W_W2, :HID, :] = np.asarray(w2)
    vec_slab[VEC_B1, :] = np.asarray(b1)[0]
    vec_slab[VEC_B2, :] = np.asarray(b2)[0]

    for li, layer in enumerate(params["gconv"]):
        cin, cout = layer["w_root"].shape
        w_slab[W_GCONV + li, :cin, :cout] = np.asarray(layer["w_root"])
        w_slab[W_GCONV + li, HID:HID + cin, :cout] = np.asarray(layer["w_rel"])
        base = VEC_GCONV + 4 * li
        vec_slab[base + 0, :cout] = np.asarray(layer["b_rel"])[0]
        vec_slab[base + 1, :cout] = np.asarray(layer["gn_w"])[0]
        vec_slab[base + 2, :cout] = np.asarray(layer["gn_b"])[0]
        vec_slab[base + 3, :cout] = np.asarray(layer["gn_alpha"])[0]

    dw1, db1, dw2, db2, dw3, db3, dw4, db4 = params["dec"]
    for di, (w, b) in enumerate(((dw1, db1), (dw2, db2), (dw3, db3))):
        cin, cout = w.shape
        w_slab[W_DEC + di, :cin, :cout] = np.asarray(w)
        vec_slab[VEC_DEC_B + di, :cout] = np.asarray(b)[0]
    vec_slab[VEC_DB4, 0] = np.asarray(db4)[0, 0]
    vec_slab[VEC_DW4T, :dw4.shape[0]] = np.asarray(dw4)[:, 0]

    return jnp.asarray(w_slab), jnp.asarray(vec_slab)


# ------------------------------ forward ------------------------------

@functools.partial(jax.jit, static_argnames=("num_types",))
def voxel_gnn_discriminator(w_slab, vec_slab, local_x, local_type, voxel_x, voxel_type,
                            edge_index, label_hard, num_types):
    f32 = jnp.float32
    n_voxel = voxel_x.shape[0]

    # Per-call glue is now only three small stacks; one_hot / adjacency scatter / squeeze are
    # built inside the kernel, and weight packing happens once in pack_params (outside the jit).
    local_slab = jnp.concatenate([local_x.astype(f32), local_type.astype(f32)[:, None]], axis=1)
    voxel_slab = jnp.concatenate([voxel_x.astype(f32), label_hard[0].astype(f32),
                                  voxel_type.astype(f32)[:, None]], axis=1)
    edge_slab = edge_index.astype(f32).T                                   # (E, 2): [src | dst]

    vmem = pl.BlockSpec(memory_space=pltpu.MemorySpace.VMEM)
    out_1n = pl.pallas_call(
        _make_kernel(num_types),
        out_shape=jax.ShapeDtypeStruct((1, n_voxel), jnp.float32),
        in_specs=[vmem] * 5,
        out_specs=vmem,
        scratch_shapes=[pltpu.VMEM((n_voxel, 2 * HID), jnp.float32)],      # [x | A@x] assembly
        compiler_params=pltpu.CompilerParams(vmem_limit_bytes=8 * 1024 * 1024),
    )(local_slab, voxel_slab, edge_slab, w_slab, vec_slab)

    # restore the module's (num_voxel, 1) output layout (kernel stores lane-dense (1, Nv))
    return out_1n.reshape(n_voxel, 1)


# -------------------- pure-JAX reference (for validation) --------------------

def _reference_forward(params, local_x, local_type, voxel_x, voxel_type,
                       edge_index, label_hard, num_types):
    oh_local = jax.nn.one_hot(local_type, num_types, dtype=jnp.float32)
    oh_voxel = jax.nn.one_hot(voxel_type, num_types, dtype=jnp.float32)
    sums = oh_local.T @ local_x
    counts = jnp.sum(oh_local, axis=0, keepdims=True).T
    means = jnp.where(counts > 0.0, sums / jnp.maximum(counts, 1.0), 0.0)
    matched = oh_voxel @ means

    x_in = jnp.concatenate([matched, voxel_x, jnp.squeeze(label_hard, 0)], axis=-1)
    w1, b1, w2, b2 = params["mlp"]
    x = jnp.maximum(x_in @ w1 + b1, 0.0)
    x = jnp.maximum(x @ w2 + b2, 0.0)

    n_voxel = voxel_x.shape[0]
    src, dst = edge_index[0], edge_index[1]
    adj = jnp.zeros((n_voxel, n_voxel), jnp.float32).at[dst, src].add(1.0)
    for layer in params["gconv"]:
        h = (adj @ x) @ layer["w_rel"] + layer["b_rel"] + x @ layer["w_root"]
        mean = jnp.mean(h, axis=0, keepdims=True)
        centered = h - mean * layer["gn_alpha"]
        var = jnp.mean(centered * centered, axis=0, keepdims=True)
        x = jnp.maximum(layer["gn_w"] * centered / jnp.sqrt(var + EPS) + layer["gn_b"], 0.0)

    dw1, db1, dw2, db2, dw3, db3, dw4, db4 = params["dec"]
    h = jnp.maximum(x @ dw1 + db1, 0.0)
    h = jnp.maximum(h @ dw2 + db2, 0.0)
    h = jnp.maximum(h @ dw3 + db3, 0.0)
    return jax.nn.sigmoid(h @ dw4 + db4)


# ------------------------------- main -------------------------------

if __name__ == "__main__":
    key = jax.random.PRNGKey(0)
    k_par, k_lx, k_lt, k_vx, k_vt, k_lb = jax.random.split(key, 6)

    N_LOCAL = 8
    N_VOXEL = 32
    NUM_TYPES = 4

    params = init_params(k_par)
    w_slab, vec_slab = pack_params(params)      # one-time packing, outside the jitted forward

    local_x = jax.random.normal(k_lx, (N_LOCAL, LOCAL_DIM), jnp.float32)
    local_type = jax.random.randint(k_lt, (N_LOCAL,), 0, NUM_TYPES)
    voxel_x = jax.random.normal(k_vx, (N_VOXEL, VOXEL_DIM), jnp.float32)
    voxel_type = jax.random.randint(k_vt, (N_VOXEL,), 0, NUM_TYPES)

    # label_hard: (1, N_VOXEL, NUM_CLASSES) hard one-hot labels
    label_cls = jax.random.randint(k_lb, (N_VOXEL,), 0, NUM_CLASSES)
    label_hard = jax.nn.one_hot(label_cls, NUM_CLASSES, dtype=jnp.float32)[None]

    # simple bidirectional ring graph over voxel nodes: edge_index (2, 64)
    idx = jnp.arange(N_VOXEL)
    src = jnp.concatenate([idx, (idx + 1) % N_VOXEL])
    dst = jnp.concatenate([(idx + 1) % N_VOXEL, idx])
    edge_index = jnp.stack([src, dst], axis=0)

    out = voxel_gnn_discriminator(w_slab, vec_slab, local_x, local_type, voxel_x, voxel_type,
                                  edge_index, label_hard, NUM_TYPES)
    out = jax.block_until_ready(out)

    assert out.shape == (N_VOXEL, 1)
    assert bool(jnp.all(jnp.isfinite(out)))
    assert bool(jnp.all((out >= 0.0) & (out <= 1.0)))

    ref = _reference_forward(params, local_x, local_type, voxel_x, voxel_type,
                             edge_index, label_hard, NUM_TYPES)
    assert bool(jnp.allclose(out, ref, rtol=2e-4, atol=5e-5))

    print("KERNEL_OK")
</pallas_src>

<mosaic_0001>
module attributes {stable_mosaic.version = 11 : i64} {
  func.func @kernel(%arg0: memref<8x9xf32, #tpu.memory_space<vmem>>, %arg1: memref<32x17xf32, #tpu.memory_space<vmem>>, %arg2: memref<64x2xf32, #tpu.memory_space<vmem>>, %arg3: memref<9x64x32xf32, #tpu.memory_space<vmem>>, %arg4: memref<23x32xf32, #tpu.memory_space<vmem>>, %arg5: memref<1x32xf32, #tpu.memory_space<vmem>>, %arg6: memref<32x64xf32, #tpu.memory_space<vmem>>) attributes {dimension_semantics = [], scalar_prefetch = 0 : i64, scratch_operands = 1 : i64, tpu.core_type = #tpu.core_type<tc>} {
    %c0 = arith.constant 0 : index
    %c0_0 = arith.constant 0 : index
    %0 = vector.load %arg0[%c0, %c0_0] : memref<8x9xf32, #tpu.memory_space<vmem>>, vector<8x9xf32>
    %c0_1 = arith.constant 0 : index
    %c0_2 = arith.constant 0 : index
    %1 = vector.load %arg1[%c0_1, %c0_2] : memref<32x17xf32, #tpu.memory_space<vmem>>, vector<32x17xf32>
    %c0_3 = arith.constant 0 : index
    %c0_4 = arith.constant 0 : index
    %2 = vector.load %arg2[%c0_3, %c0_4] : memref<64x2xf32, #tpu.memory_space<vmem>>, vector<64x2xf32>
    %c0_5 = arith.constant 0 : index
    %c0_6 = arith.constant 0 : index
    %3 = vector.load %arg4[%c0_5, %c0_6] : memref<23x32xf32, #tpu.memory_space<vmem>>, vector<23x32xf32>
    %4 = vector.extract_strided_slice %0 {offsets = [0, 0], sizes = [8, 8], strides = [1, 1]} : vector<8x9xf32> to vector<8x8xf32>
    %5 = vector.extract_strided_slice %0 {offsets = [0, 8], sizes = [8, 1], strides = [1, 1]} : vector<8x9xf32> to vector<8x1xf32>
    %6 = vector.extract_strided_slice %1 {offsets = [0, 0], sizes = [32, 16], strides = [1, 1]} : vector<32x17xf32> to vector<32x16xf32>
    %7 = vector.extract_strided_slice %1 {offsets = [0, 16], sizes = [32, 1], strides = [1, 1]} : vector<32x17xf32> to vector<32x1xf32>
    %8 = vector.extract_strided_slice %2 {offsets = [0, 0], sizes = [64, 1], strides = [1, 1]} : vector<64x2xf32> to vector<64x1xf32>
    %9 = vector.extract_strided_slice %2 {offsets = [0, 1], sizes = [64, 1], strides = [1, 1]} : vector<64x2xf32> to vector<64x1xf32>
    %10 = tpu.iota {dimensions = array<i32: 1>} : vector<8x4xi32>
    %11 = arith.sitofp %10 : vector<8x4xi32> to vector<8x4xf32>
    %12 = vector.broadcast %5 : vector<8x1xf32> to vector<8x4xf32>
    %13 = arith.cmpf oeq, %11, %12 : vector<8x4xf32>
    %cst = arith.constant 1.000000e+00 : f32
    %cst_7 = arith.constant 0.000000e+00 : f32
    %14 = vector.broadcast %cst : f32 to vector<8x4xf32>
    %15 = vector.broadcast %cst_7 : f32 to vector<8x4xf32>
    %16 = arith.select %13, %14, %15 : vector<8x4xi1>, vector<8x4xf32>
    %17 = tpu.iota {dimensions = array<i32: 1>} : vector<32x4xi32>
    %18 = arith.sitofp %17 : vector<32x4xi32> to vector<32x4xf32>
    %19 = vector.broadcast %7 : vector<32x1xf32> to vector<32x4xf32>
    %20 = arith.cmpf oeq, %18, %19 : vector<32x4xf32>
    %cst_8 = arith.constant 1.000000e+00 : f32
    %cst_9 = arith.constant 0.000000e+00 : f32
    %21 = vector.broadcast %cst_8 : f32 to vector<32x4xf32>
    %22 = vector.broadcast %cst_9 : f32 to vector<32x4xf32>
    %23 = arith.select %20, %21, %22 : vector<32x4xi1>, vector<32x4xf32>
    %24 = tpu.iota {dimensions = array<i32: 1>} : vector<64x32xi32>
    %25 = arith.sitofp %24 : vector<64x32xi32> to vector<64x32xf32>
    %26 = vector.broadcast %8 : vector<64x1xf32> to vector<64x32xf32>
    %27 = arith.cmpf oeq, %25, %26 : vector<64x32xf32>
    %cst_10 = arith.constant 1.000000e+00 : f32
    %cst_11 = arith.constant 0.000000e+00 : f32
    %28 = vector.broadcast %cst_10 : f32 to vector<64x32xf32>
    %29 = vector.broadcast %cst_11 : f32 to vector<64x32xf32>
    %30 = arith.select %27, %28, %29 : vector<64x32xi1>, vector<64x32xf32>
    %31 = tpu.iota {dimensions = array<i32: 1>} : vector<64x32xi32>
    %32 = arith.sitofp %31 : vector<64x32xi32> to vector<64x32xf32>
    %33 = vector.broadcast %9 : vector<64x1xf32> to vector<64x32xf32>
    %34 = arith.cmpf oeq, %32, %33 : vector<64x32xf32>
    %cst_12 = arith.constant 1.000000e+00 : f32
    %cst_13 = arith.constant 0.000000e+00 : f32
    %35 = vector.broadcast %cst_12 : f32 to vector<64x32xf32>
    %36 = vector.broadcast %cst_13 : f32 to vector<64x32xf32>
    %37 = arith.select %34, %35, %36 : vector<64x32xi1>, vector<64x32xf32>
    %cst_14 = arith.constant dense<0.000000e+00> : vector<32x32xf32>
    %38 = tpu.matmul %37, %30, %cst_14 {dimension_numbers = #tpu.dot_dimension_numbers<[0], [0], [1], [1], [0, 1, 1, 1], [], []>} : vector<64x32xf32>, vector<64x32xf32>, vector<32x32xf32> -> vector<32x32xf32>
    %cst_15 = arith.constant dense<0.000000e+00> : vector<4x8xf32>
    %39 = tpu.matmul %16, %4, %cst_15 {dimension_numbers = #tpu.dot_dimension_numbers<[0], [0], [1], [1], [0, 1, 1, 1], [], []>} : vector<8x4xf32>, vector<8x8xf32>, vector<4x8xf32> -> vector<4x8xf32>
    %cst_16 = arith.constant 1.000000e+00 : f32
    %40 = vector.broadcast %cst_16 : f32 to vector<8x1xf32>
    %cst_17 = arith.constant dense<0.000000e+00> : vector<4x1xf32>
    %41 = tpu.matmul %16, %40, %cst_17 {dimension_numbers = #tpu.dot_dimension_numbers<[0], [0], [1], [1], [0, 1, 1, 1], [], []>} : vector<8x4xf32>, vector<8x1xf32>, vector<4x1xf32> -> vector<4x1xf32>
    %cst_18 = arith.constant 0.000000e+00 : f32
    %42 = vector.broadcast %cst_18 : f32 to vector<4x1xf32>
    %43 = arith.cmpf ogt, %41, %42 : vector<4x1xf32>
    %cst_19 = arith.constant 1.000000e+00 : f32
    %44 = vector.broadcast %cst_19 : f32 to vector<4x1xf32>
    %45 = arith.maximumf %41, %44 : vector<4x1xf32>
    %46 = vector.broadcast %45 : vector<4x1xf32> to vector<4x8xf32>
    %47 = arith.divf %39, %46 : vector<4x8xf32>
    %cst_20 = arith.constant 0.000000e+00 : f32
    %48 = vector.shape_cast %43 : vector<4x1xi1> to vector<4x1xi1>
    %49 = vector.broadcast %48 : vector<4x1xi1> to vector<4x8xi1>
    %50 = vector.broadcast %cst_20 : f32 to vector<4x8xf32>
    %51 = arith.select %49, %47, %50 : vector<4x8xi1>, vector<4x8xf32>
    %cst_21 = arith.constant dense<0.000000e+00> : vector<32x8xf32>
    %52 = tpu.matmul %23, %51, %cst_21 {dimension_numbers = #tpu.dot_dimension_numbers<[1], [0], [0], [1], [0, 0, 1, 1], [], []>} : vector<32x4xf32>, vector<4x8xf32>, vector<32x8xf32> -> vector<32x8xf32>
    %c0_22 = arith.constant 0 : index
    %c0_23 = arith.constant 0 : index
    %53 = vector.load %arg6[%c0_22, %c0_23] : memref<32x64xf32, #tpu.memory_space<vmem>>, vector<32x8xf32>
    tpu.vector_store %arg6[%c0_22, %c0_23], %52 {strides = array<i32>} : memref<32x64xf32, #tpu.memory_space<vmem>>, vector<32x8xf32>,
    %c0_24 = arith.constant 0 : index
    %c8 = arith.constant 8 : index
    %54 = vector.load %arg6[%c0_24, %c8] : memref<32x64xf32, #tpu.memory_space<vmem>>, vector<32x16xf32>
    tpu.vector_store %arg6[%c0_24, %c8], %6 {strides = array<i32>} : memref<32x64xf32, #tpu.memory_space<vmem>>, vector<32x16xf32>,
    %c0_25 = arith.constant 0 : index
    %c0_26 = arith.constant 0 : index
    %55 = vector.load %arg6[%c0_25, %c0_26] : memref<32x64xf32, #tpu.memory_space<vmem>>, vector<32x24xf32>
    %56 = vector.extract_strided_slice %3 {offsets = [0, 0], sizes = [1, 32], strides = [1, 1]} : vector<23x32xf32> to vector<1x32xf32>
    %57 = vector.extract_strided_slice %3 {offsets = [1, 0], sizes = [1, 32], strides = [1, 1]} : vector<23x32xf32> to vector<1x32xf32>
    %c0_27 = arith.constant 0 : index
    %c0_28 = arith.constant 0 : index
    %c0_29 = arith.constant 0 : index
    %58 = vector.load %arg3[%c0_27, %c0_28, %c0_29] : memref<9x64x32xf32, #tpu.memory_space<vmem>>, vector<1x24x32xf32>
    %59 = vector.shape_cast %58 : vector<1x24x32xf32> to vector<24x32xf32>
    %cst_30 = arith.constant dense<0.000000e+00> : vector<32x32xf32>
    %60 = tpu.matmul %55, %59, %cst_30 {dimension_numbers = #tpu.dot_dimension_numbers<[1], [0], [0], [1], [0, 0, 1, 1], [], []>} : vector<32x24xf32>, vector<24x32xf32>, vector<32x32xf32> -> vector<32x32xf32>
    %61 = vector.broadcast %56 : vector<1x32xf32> to vector<32x32xf32>
    %62 = arith.addf %60, %61 : vector<32x32xf32>
    %cst_31 = arith.constant 0.000000e+00 : f32
    %63 = vector.broadcast %cst_31 : f32 to vector<32x32xf32>
    %64 = arith.maximumf %62, %63 : vector<32x32xf32>
    %c1 = arith.constant 1 : index
    %c0_32 = arith.constant 0 : index
    %c0_33 = arith.constant 0 : index
    %65 = vector.load %arg3[%c1, %c0_32, %c0_33] : memref<9x64x32xf32, #tpu.memory_space<vmem>>, vector<1x32x32xf32>
    %66 = vector.shape_cast %65 : vector<1x32x32xf32> to vector<32x32xf32>
    %cst_34 = arith.constant dense<0.000000e+00> : vector<32x32xf32>
    %67 = tpu.matmul %64, %66, %cst_34 {dimension_numbers = #tpu.dot_dimension_numbers<[1], [0], [0], [1], [0, 0, 1, 1], [], []>} : vector<32x32xf32>, vector<32x32xf32>, vector<32x32xf32> -> vector<32x32xf32>
    %68 = vector.broadcast %57 : vector<1x32xf32> to vector<32x32xf32>
    %69 = arith.addf %67, %68 : vector<32x32xf32>
    %cst_35 = arith.constant 0.000000e+00 : f32
    %70 = vector.broadcast %cst_35 : f32 to vector<32x32xf32>
    %71 = arith.maximumf %69, %70 : vector<32x32xf32>
    %cst_36 = arith.constant 1.000000e+00 : f32
    %72 = vector.broadcast %cst_36 : f32 to vector<1x32xf32>
    %73 = vector.extract_strided_slice %3 {offsets = [2, 0], sizes = [1, 32], strides = [1, 1]} : vector<23x32xf32> to vector<1x32xf32>
    %74 = vector.extract_strided_slice %3 {offsets = [3, 0], sizes = [1, 32], strides = [1, 1]} : vector<23x32xf32> to vector<1x32xf32>
    %75 = vector.extract_strided_slice %3 {offsets = [4, 0], sizes = [1, 32], strides = [1, 1]} : vector<23x32xf32> to vector<1x32xf32>
    %76 = vector.extract_strided_slice %3 {offsets = [5, 0], sizes = [1, 32], strides = [1, 1]} : vector<23x32xf32> to vector<1x32xf32>
    %cst_37 = arith.constant dense<0.000000e+00> : vector<32x32xf32>
    %77 = tpu.matmul %38, %71, %cst_37 {dimension_numbers = #tpu.dot_dimension_numbers<[1], [0], [0], [1], [0, 0, 1, 1], [], []>} : vector<32x32xf32>, vector<32x32xf32>, vector<32x32xf32> -> vector<32x32xf32>
    %c0_38 = arith.constant 0 : index
    %c0_39 = arith.constant 0 : index
    %78 = vector.load %arg6[%c0_38, %c0_39] : memref<32x64xf32, #tpu.memory_space<vmem>>, vector<32x32xf32>
    tpu.vector_store %arg6[%c0_38, %c0_39], %71 {strides = array<i32>} : memref<32x64xf32, #tpu.memory_space<vmem>>, vector<32x32xf32>,
    %c0_40 = arith.constant 0 : index
    %c32 = arith.constant 32 : index
    %79 = vector.load %arg6[%c0_40, %c32] : memref<32x64xf32, #tpu.memory_space<vmem>>, vector<32x32xf32>
    tpu.vector_store %arg6[%c0_40, %c32], %77 {strides = array<i32>} : memref<32x64xf32, #tpu.memory_space<vmem>>, vector<32x32xf32>,
    %c0_41 = arith.constant 0 : index
    %c0_42 = arith.constant 0 : index
    %80 = vector.load %arg6[%c0_41, %c0_42] : memref<32x64xf32, #tpu.memory_space<vmem>>, vector<32x64xf32>
    %c2 = arith.constant 2 : index
    %c0_43 = arith.constant 0 : index
    %c0_44 = arith.constant 0 : index
    %81 = vector.load %arg3[%c2, %c0_43, %c0_44] : memref<9x64x32xf32, #tpu.memory_space<vmem>>, vector<1x64x32xf32>
    %82 = vector.shape_cast %81 : vector<1x64x32xf32> to vector<64x32xf32>
    %cst_45 = arith.constant dense<0.000000e+00> : vector<32x32xf32>
    %83 = tpu.matmul %80, %82, %cst_45 {dimension_numbers = #tpu.dot_dimension_numbers<[1], [0], [0], [1], [0, 0, 1, 1], [], []>} : vector<32x64xf32>, vector<64x32xf32>, vector<32x32xf32> -> vector<32x32xf32>
    %84 = vector.broadcast %73 : vector<1x32xf32> to vector<32x32xf32>
    %85 = arith.addf %83, %84 : vector<32x32xf32>
    %cst_46 = arith.constant dense<0.000000e+00> : vector<1x32xf32>
    %86 = tpu.matmul %72, %85, %cst_46 {dimension_numbers = #tpu.dot_dimension_numbers<[1], [0], [0], [1], [0, 0, 1, 1], [], []>} : vector<1x32xf32>, vector<32x32xf32>, vector<1x32xf32> -> vector<1x32xf32>
    %cst_47 = arith.constant 3.125000e-02 : f32
    %87 = vector.broadcast %cst_47 : f32 to vector<1x32xf32>
    %88 = arith.mulf %86, %87 : vector<1x32xf32>
    %89 = arith.mulf %88, %76 : vector<1x32xf32>
    %90 = vector.broadcast %89 : vector<1x32xf32> to vector<32x32xf32>
    %91 = arith.subf %85, %90 : vector<32x32xf32>
    %92 = arith.mulf %91, %91 : vector<32x32xf32>
    %cst_48 = arith.constant dense<0.000000e+00> : vector<1x32xf32>
    %93 = tpu.matmul %72, %92, %cst_48 {dimension_numbers = #tpu.dot_dimension_numbers<[1], [0], [0], [1], [0, 0, 1, 1], [], []>} : vector<1x32xf32>, vector<32x32xf32>, vector<1x32xf32> -> vector<1x32xf32>
    %cst_49 = arith.constant 3.125000e-02 : f32
    %94 = vector.broadcast %cst_49 : f32 to vector<1x32xf32>
    %95 = arith.mulf %93, %94 : vector<1x32xf32>
    %cst_50 = arith.constant 9.99999974E-6 : f32
    %96 = vector.broadcast %cst_50 : f32 to vector<1x32xf32>
    %97 = arith.addf %95, %96 : vector<1x32xf32>
    %98 = math.rsqrt %97 : vector<1x32xf32>
    %99 = arith.mulf %74, %98 : vector<1x32xf32>
    %100 = vector.broadcast %99 : vector<1x32xf32> to vector<32x32xf32>
    %101 = arith.mulf %91, %100 : vector<32x32xf32>
    %102 = vector.broadcast %75 : vector<1x32xf32> to vector<32x32xf32>
    %103 = arith.addf %101, %102 : vector<32x32xf32>
    %cst_51 = arith.constant 0.000000e+00 : f32
    %104 = vector.broadcast %cst_51 : f32 to vector<32x32xf32>
    %105 = arith.maximumf %103, %104 : vector<32x32xf32>
    %106 = vector.extract_strided_slice %3 {offsets = [6, 0], sizes = [1, 32], strides = [1, 1]} : vector<23x32xf32> to vector<1x32xf32>
    %107 = vector.extract_strided_slice %3 {offsets = [7, 0], sizes = [1, 32], strides = [1, 1]} : vector<23x32xf32> to vector<1x32xf32>
    %108 = vector.extract_strided_slice %3 {offsets = [8, 0], sizes = [1, 32], strides = [1, 1]} : vector<23x32xf32> to vector<1x32xf32>
    %109 = vector.extract_strided_slice %3 {offsets = [9, 0], sizes = [1, 32], strides = [1, 1]} : vector<23x32xf32> to vector<1x32xf32>
    %cst_52 = arith.constant dense<0.000000e+00> : vector<32x32xf32>
    %110 = tpu.matmul %38, %105, %cst_52 {dimension_numbers = #tpu.dot_dimension_numbers<[1], [0], [0], [1], [0, 0, 1, 1], [], []>} : vector<32x32xf32>, vector<32x32xf32>, vector<32x32xf32> -> vector<32x32xf32>
    %c0_53 = arith.constant 0 : index
    %c0_54 = arith.constant 0 : index
    %111 = vector.load %arg6[%c0_53, %c0_54] : memref<32x64xf32, #tpu.memory_space<vmem>>, vector<32x32xf32>
    tpu.vector_store %arg6[%c0_53, %c0_54], %105 {strides = array<i32>} : memref<32x64xf32, #tpu.memory_space<vmem>>, vector<32x32xf32>,
    %c0_55 = arith.constant 0 : index
    %c32_56 = arith.constant 32 : index
    %112 = vector.load %arg6[%c0_55, %c32_56] : memref<32x64xf32, #tpu.memory_space<vmem>>, vector<32x32xf32>
    tpu.vector_store %arg6[%c0_55, %c32_56], %110 {strides = array<i32>} : memref<32x64xf32, #tpu.memory_space<vmem>>, vector<32x32xf32>,
    %c0_57 = arith.constant 0 : index
    %c0_58 = arith.constant 0 : index
    %113 = vector.load %arg6[%c0_57, %c0_58] : memref<32x64xf32, #tpu.memory_space<vmem>>, vector<32x64xf32>
    %c3 = arith.constant 3 : index
    %c0_59 = arith.constant 0 : index
    %c0_60 = arith.constant 0 : index
    %114 = vector.load %arg3[%c3, %c0_59, %c0_60] : memref<9x64x32xf32, #tpu.memory_space<vmem>>, vector<1x64x32xf32>
    %115 = vector.shape_cast %114 : vector<1x64x32xf32> to vector<64x32xf32>
    %cst_61 = arith.constant dense<0.000000e+00> : vector<32x32xf32>
    %116 = tpu.matmul %113, %115, %cst_61 {dimension_numbers = #tpu.dot_dimension_numbers<[1], [0], [0], [1], [0, 0, 1, 1], [], []>} : vector<32x64xf32>, vector<64x32xf32>, vector<32x32xf32> -> vector<32x32xf32>
    %117 = vector.broadcast %106 : vector<1x32xf32> to vector<32x32xf32>
    %118 = arith.addf %116, %117 : vector<32x32xf32>
    %cst_62 = arith.constant dense<0.000000e+00> : vector<1x32xf32>
    %119 = tpu.matmul %72, %118, %cst_62 {dimension_numbers = #tpu.dot_dimension_numbers<[1], [0], [0], [1], [0, 0, 1, 1], [], []>} : vector<1x32xf32>, vector<32x32xf32>, vector<1x32xf32> -> vector<1x32xf32>
    %cst_63 = arith.constant 3.125000e-02 : f32
    %120 = vector.broadcast %cst_63 : f32 to vector<1x32xf32>
    %121 = arith.mulf %119, %120 : vector<1x32xf32>
    %122 = arith.mulf %121, %109 : vector<1x32xf32>
    %123 = vector.broadcast %122 : vector<1x32xf32> to vector<32x32xf32>
    %124 = arith.subf %118, %123 : vector<32x32xf32>
    %125 = arith.mulf %124, %124 : vector<32x32xf32>
    %cst_64 = arith.constant dense<0.000000e+00> : vector<1x32xf32>
    %126 = tpu.matmul %72, %125, %cst_64 {dimension_numbers = #tpu.dot_dimension_numbers<[1], [0], [0], [1], [0, 0, 1, 1], [], []>} : vector<1x32xf32>, vector<32x32xf32>, vector<1x32xf32> -> vector<1x32xf32>
    %cst_65 = arith.constant 3.125000e-02 : f32
    %127 = vector.broadcast %cst_65 : f32 to vector<1x32xf32>
    %128 = arith.mulf %126, %127 : vector<1x32xf32>
    %cst_66 = arith.constant 9.99999974E-6 : f32
    %129 = vector.broadcast %cst_66 : f32 to vector<1x32xf32>
    %130 = arith.addf %128, %129 : vector<1x32xf32>
    %131 = math.rsqrt %130 : vector<1x32xf32>
    %132 = arith.mulf %107, %131 : vector<1x32xf32>
    %133 = vector.broadcast %132 : vector<1x32xf32> to vector<32x32xf32>
    %134 = arith.mulf %124, %133 : vector<32x32xf32>
    %135 = vector.broadcast %108 : vector<1x32xf32> to vector<32x32xf32>
    %136 = arith.addf %134, %135 : vector<32x32xf32>
    %cst_67 = arith.constant 0.000000e+00 : f32
    %137 = vector.broadcast %cst_67 : f32 to vector<32x32xf32>
    %138 = arith.maximumf %136, %137 : vector<32x32xf32>
    %139 = vector.extract_strided_slice %3 {offsets = [10, 0], sizes = [1, 32], strides = [1, 1]} : vector<23x32xf32> to vector<1x32xf32>
    %140 = vector.extract_strided_slice %3 {offsets = [11, 0], sizes = [1, 32], strides = [1, 1]} : vector<23x32xf32> to vector<1x32xf32>
    %141 = vector.extract_strided_slice %3 {offsets = [12, 0], sizes = [1, 32], strides = [1, 1]} : vector<23x32xf32> to vector<1x32xf32>
    %142 = vector.extract_strided_slice %3 {offsets = [13, 0], sizes = [1, 32], strides = [1, 1]} : vector<23x32xf32> to vector<1x32xf32>
    %cst_68 = arith.constant dense<0.000000e+00> : vector<32x32xf32>
    %143 = tpu.matmul %38, %138, %cst_68 {dimension_numbers = #tpu.dot_dimension_numbers<[1], [0], [0], [1], [0, 0, 1, 1], [], []>} : vector<32x32xf32>, vector<32x32xf32>, vector<32x32xf32> -> vector<32x32xf32>
    %c0_69 = arith.constant 0 : index
    %c0_70 = arith.constant 0 : index
    %144 = vector.load %arg6[%c0_69, %c0_70] : memref<32x64xf32, #tpu.memory_space<vmem>>, vector<32x32xf32>
    tpu.vector_store %arg6[%c0_69, %c0_70], %138 {strides = array<i32>} : memref<32x64xf32, #tpu.memory_space<vmem>>, vector<32x32xf32>,
    %c0_71 = arith.constant 0 : index
    %c32_72 = arith.constant 32 : index
    %145 = vector.load %arg6[%c0_71, %c32_72] : memref<32x64xf32, #tpu.memory_space<vmem>>, vector<32x32xf32>
    tpu.vector_store %arg6[%c0_71, %c32_72], %143 {strides = array<i32>} : memref<32x64xf32, #tpu.memory_space<vmem>>, vector<32x32xf32>,
    %c0_73 = arith.constant 0 : index
    %c0_74 = arith.constant 0 : index
    %146 = vector.load %arg6[%c0_73, %c0_74] : memref<32x64xf32, #tpu.memory_space<vmem>>, vector<32x64xf32>
    %c4 = arith.constant 4 : index
    %c0_75 = arith.constant 0 : index
    %c0_76 = arith.constant 0 : index
    %147 = vector.load %arg3[%c4, %c0_75, %c0_76] : memref<9x64x32xf32, #tpu.memory_space<vmem>>, vector<1x64x32xf32>
    %148 = vector.shape_cast %147 : vector<1x64x32xf32> to vector<64x32xf32>
    %cst_77 = arith.constant dense<0.000000e+00> : vector<32x32xf32>
    %149 = tpu.matmul %146, %148, %cst_77 {dimension_numbers = #tpu.dot_dimension_numbers<[1], [0], [0], [1], [0, 0, 1, 1], [], []>} : vector<32x64xf32>, vector<64x32xf32>, vector<32x32xf32> -> vector<32x32xf32>
    %150 = vector.broadcast %139 : vector<1x32xf32> to vector<32x32xf32>
    %151 = arith.addf %149, %150 : vector<32x32xf32>
    %cst_78 = arith.constant dense<0.000000e+00> : vector<1x32xf32>
    %152 = tpu.matmul %72, %151, %cst_78 {dimension_numbers = #tpu.dot_dimension_numbers<[1], [0], [0], [1], [0, 0, 1, 1], [], []>} : vector<1x32xf32>, vector<32x32xf32>, vector<1x32xf32> -> vector<1x32xf32>
    %cst_79 = arith.constant 3.125000e-02 : f32
    %153 = vector.broadcast %cst_79 : f32 to vector<1x32xf32>
    %154 = arith.mulf %152, %153 : vector<1x32xf32>
    %155 = arith.mulf %154, %142 : vector<1x32xf32>
    %156 = vector.broadcast %155 : vector<1x32xf32> to vector<32x32xf32>
    %157 = arith.subf %151, %156 : vector<32x32xf32>
    %158 = arith.mulf %157, %157 : vector<32x32xf32>
    %cst_80 = arith.constant dense<0.000000e+00> : vector<1x32xf32>
    %159 = tpu.matmul %72, %158, %cst_80 {dimension_numbers = #tpu.dot_dimension_numbers<[1], [0], [0], [1], [0, 0, 1, 1], [], []>} : vector<1x32xf32>, vector<32x32xf32>, vector<1x32xf32> -> vector<1x32xf32>
    %cst_81 = arith.constant 3.125000e-02 : f32
    %160 = vector.broadcast %cst_81 : f32 to vector<1x32xf32>
    %161 = arith.mulf %159, %160 : vector<1x32xf32>
    %cst_82 = arith.constant 9.99999974E-6 : f32
    %162 = vector.broadcast %cst_82 : f32 to vector<1x32xf32>
    %163 = arith.addf %161, %162 : vector<1x32xf32>
    %164 = math.rsqrt %163 : vector<1x32xf32>
    %165 = arith.mulf %140, %164 : vector<1x32xf32>
    %166 = vector.broadcast %165 : vector<1x32xf32> to vector<32x32xf32>
    %167 = arith.mulf %157, %166 : vector<32x32xf32>
    %168 = vector.broadcast %141 : vector<1x32xf32> to vector<32x32xf32>
    %169 = arith.addf %167, %168 : vector<32x32xf32>
    %cst_83 = arith.constant 0.000000e+00 : f32
    %170 = vector.broadcast %cst_83 : f32 to vector<32x32xf32>
    %171 = arith.maximumf %169, %170 : vector<32x32xf32>
    %172 = vector.extract_strided_slice %3 {offsets = [14, 0], sizes = [1, 32], strides = [1, 1]} : vector<23x32xf32> to vector<1x32xf32>
    %173 = vector.extract_strided_slice %3 {offsets = [15, 0], sizes = [1, 32], strides = [1, 1]} : vector<23x32xf32> to vector<1x32xf32>
    %174 = vector.extract_strided_slice %3 {offsets = [16, 0], sizes = [1, 32], strides = [1, 1]} : vector<23x32xf32> to vector<1x32xf32>
    %175 = vector.extract_strided_slice %3 {offsets = [17, 0], sizes = [1, 32], strides = [1, 1]} : vector<23x32xf32> to vector<1x32xf32>
    %cst_84 = arith.constant dense<0.000000e+00> : vector<32x32xf32>
    %176 = tpu.matmul %38, %171, %cst_84 {dimension_numbers = #tpu.dot_dimension_numbers<[1], [0], [0], [1], [0, 0, 1, 1], [], []>} : vector<32x32xf32>, vector<32x32xf32>, vector<32x32xf32> -> vector<32x32xf32>
    %c0_85 = arith.constant 0 : index
    %c0_86 = arith.constant 0 : index
    %177 = vector.load %arg6[%c0_85, %c0_86] : memref<32x64xf32, #tpu.memory_space<vmem>>, vector<32x32xf32>
    tpu.vector_store %arg6[%c0_85, %c0_86], %171 {strides = array<i32>} : memref<32x64xf32, #tpu.memory_space<vmem>>, vector<32x32xf32>,
    %c0_87 = arith.constant 0 : index
    %c32_88 = arith.constant 32 : index
    %178 = vector.load %arg6[%c0_87, %c32_88] : memref<32x64xf32, #tpu.memory_space<vmem>>, vector<32x32xf32>
    tpu.vector_store %arg6[%c0_87, %c32_88], %176 {strides = array<i32>} : memref<32x64xf32, #tpu.memory_space<vmem>>, vector<32x32xf32>,
    %c0_89 = arith.constant 0 : index
    %c0_90 = arith.constant 0 : index
    %179 = vector.load %arg6[%c0_89, %c0_90] : memref<32x64xf32, #tpu.memory_space<vmem>>, vector<32x64xf32>
    %c5 = arith.constant 5 : index
    %c0_91 = arith.constant 0 : index
    %c0_92 = arith.constant 0 : index
    %180 = vector.load %arg3[%c5, %c0_91, %c0_92] : memref<9x64x32xf32, #tpu.memory_space<vmem>>, vector<1x64x32xf32>
    %181 = vector.shape_cast %180 : vector<1x64x32xf32> to vector<64x32xf32>
    %cst_93 = arith.constant dense<0.000000e+00> : vector<32x32xf32>
    %182 = tpu.matmul %179, %181, %cst_93 {dimension_numbers = #tpu.dot_dimension_numbers<[1], [0], [0], [1], [0, 0, 1, 1], [], []>} : vector<32x64xf32>, vector<64x32xf32>, vector<32x32xf32> -> vector<32x32xf32>
    %183 = vector.broadcast %172 : vector<1x32xf32> to vector<32x32xf32>
    %184 = arith.addf %182, %183 : vector<32x32xf32>
    %cst_94 = arith.constant dense<0.000000e+00> : vector<1x32xf32>
    %185 = tpu.matmul %72, %184, %cst_94 {dimension_numbers = #tpu.dot_dimension_numbers<[1], [0], [0], [1], [0, 0, 1, 1], [], []>} : vector<1x32xf32>, vector<32x32xf32>, vector<1x32xf32> -> vector<1x32xf32>
    %cst_95 = arith.constant 3.125000e-02 : f32
    %186 = vector.broadcast %cst_95 : f32 to vector<1x32xf32>
    %187 = arith.mulf %185, %186 : vector<1x32xf32>
    %188 = arith.mulf %187, %175 : vector<1x32xf32>
    %189 = vector.broadcast %188 : vector<1x32xf32> to vector<32x32xf32>
    %190 = arith.subf %184, %189 : vector<32x32xf32>
    %191 = arith.mulf %190, %190 : vector<32x32xf32>
    %cst_96 = arith.constant dense<0.000000e+00> : vector<1x32xf32>
    %192 = tpu.matmul %72, %191, %cst_96 {dimension_numbers = #tpu.dot_dimension_numbers<[1], [0], [0], [1], [0, 0, 1, 1], [], []>} : vector<1x32xf32>, vector<32x32xf32>, vector<1x32xf32> -> vector<1x32xf32>
    %cst_97 = arith.constant 3.125000e-02 : f32
    %193 = vector.broadcast %cst_97 : f32 to vector<1x32xf32>
    %194 = arith.mulf %192, %193 : vector<1x32xf32>
    %cst_98 = arith.constant 9.99999974E-6 : f32
    %195 = vector.broadcast %cst_98 : f32 to vector<1x32xf32>
    %196 = arith.addf %194, %195 : vector<1x32xf32>
    %197 = math.rsqrt %196 : vector<1x32xf32>
    %198 = arith.mulf %173, %197 : vector<1x32xf32>
    %199 = vector.broadcast %198 : vector<1x32xf32> to vector<32x32xf32>
    %200 = arith.mulf %190, %199 : vector<32x32xf32>
    %201 = vector.broadcast %174 : vector<1x32xf32> to vector<32x32xf32>
    %202 = arith.addf %200, %201 : vector<32x32xf32>
    %cst_99 = arith.constant 0.000000e+00 : f32
    %203 = vector.broadcast %cst_99 : f32 to vector<32x32xf32>
    %204 = arith.maximumf %202, %203 : vector<32x32xf32>
    %205 = vector.extract_strided_slice %3 {offsets = [18, 0], sizes = [1, 32], strides = [1, 1]} : vector<23x32xf32> to vector<1x32xf32>
    %c6 = arith.constant 6 : index
    %c0_100 = arith.constant 0 : index
    %c0_101 = arith.constant 0 : index
    %206 = vector.load %arg3[%c6, %c0_100, %c0_101] : memref<9x64x32xf32, #tpu.memory_space<vmem>>, vector<1x32x32xf32>
    %207 = vector.shape_cast %206 : vector<1x32x32xf32> to vector<32x32xf32>
    %cst_102 = arith.constant dense<0.000000e+00> : vector<32x32xf32>
    %208 = tpu.matmul %204, %207, %cst_102 {dimension_numbers = #tpu.dot_dimension_numbers<[1], [0], [0], [1], [0, 0, 1, 1], [], []>} : vector<32x32xf32>, vector<32x32xf32>, vector<32x32xf32> -> vector<32x32xf32>
    %209 = vector.broadcast %205 : vector<1x32xf32> to vector<32x32xf32>
    %210 = arith.addf %208, %209 : vector<32x32xf32>
    %cst_103 = arith.constant 0.000000e+00 : f32
    %211 = vector.broadcast %cst_103 : f32 to vector<32x32xf32>
    %212 = arith.maximumf %210, %211 : vector<32x32xf32>
    %213 = vector.extract_strided_slice %3 {offsets = [19, 0], sizes = [1, 32], strides = [1, 1]} : vector<23x32xf32> to vector<1x32xf32>
    %c7 = arith.constant 7 : index
    %c0_104 = arith.constant 0 : index
    %c0_105 = arith.constant 0 : index
    %214 = vector.load %arg3[%c7, %c0_104, %c0_105] : memref<9x64x32xf32, #tpu.memory_space<vmem>>, vector<1x32x32xf32>
    %215 = vector.shape_cast %214 : vector<1x32x32xf32> to vector<32x32xf32>
    %cst_106 = arith.constant dense<0.000000e+00> : vector<32x32xf32>
    %216 = tpu.matmul %212, %215, %cst_106 {dimension_numbers = #tpu.dot_dimension_numbers<[1], [0], [0], [1], [0, 0, 1, 1], [], []>} : vector<32x32xf32>, vector<32x32xf32>, vector<32x32xf32> -> vector<32x32xf32>
    %217 = vector.broadcast %213 : vector<1x32xf32> to vector<32x32xf32>
    %218 = arith.addf %216, %217 : vector<32x32xf32>
    %cst_107 = arith.constant 0.000000e+00 : f32
    %219 = vector.broadcast %cst_107 : f32 to vector<32x32xf32>
    %220 = arith.maximumf %218, %219 : vector<32x32xf32>
    %221 = vector.extract_strided_slice %3 {offsets = [20, 0], sizes = [1, 32], strides = [1, 1]} : vector<23x32xf32> to vector<1x32xf32>
    %c8_108 = arith.constant 8 : index
    %c0_109 = arith.constant 0 : index
    %c0_110 = arith.constant 0 : index
    %222 = vector.load %arg3[%c8_108, %c0_109, %c0_110] : memref<9x64x32xf32, #tpu.memory_space<vmem>>, vector<1x32x32xf32>
    %223 = vector.shape_cast %222 : vector<1x32x32xf32> to vector<32x32xf32>
    %cst_111 = arith.constant dense<0.000000e+00> : vector<32x32xf32>
    %224 = tpu.matmul %220, %223, %cst_111 {dimension_numbers = #tpu.dot_dimension_numbers<[1], [0], [0], [1], [0, 0, 1, 1], [], []>} : vector<32x32xf32>, vector<32x32xf32>, vector<32x32xf32> -> vector<32x32xf32>
    %225 = vector.broadcast %221 : vector<1x32xf32> to vector<32x32xf32>
    %226 = arith.addf %224, %225 : vector<32x32xf32>
    %cst_112 = arith.constant 0.000000e+00 : f32
    %227 = vector.broadcast %cst_112 : f32 to vector<32x32xf32>
    %228 = arith.maximumf %226, %227 : vector<32x32xf32>
    %229 = vector.extract_strided_slice %3 {offsets = [22, 0], sizes = [1, 32], strides = [1, 1]} : vector<23x32xf32> to vector<1x32xf32>
    %230 = vector.extract_strided_slice %3 {offsets = [21, 0], sizes = [1, 1], strides = [1, 1]} : vector<23x32xf32> to vector<1x1xf32>
    %cst_113 = arith.constant dense<0.000000e+00> : vector<1x32xf32>
    %231 = tpu.matmul %229, %228, %cst_113 {dimension_numbers = #tpu.dot_dimension_numbers<[1], [1], [0], [0], [0, 0, 1, 0], [], []>} : vector<1x32xf32>, vector<32x32xf32>, vector<1x32xf32> -> vector<1x32xf32>
    %232 = vector.broadcast %230 : vector<1x1xf32> to vector<1x32xf32>
    %233 = arith.addf %231, %232 : vector<1x32xf32>
    %234 = arith.negf %233 : vector<1x32xf32>
    %235 = math.exp %234 : vector<1x32xf32>
    %cst_114 = arith.constant 1.000000e+00 : f32
    %236 = vector.broadcast %cst_114 : f32 to vector<1x32xf32>
    %237 = arith.addf %236, %235 : vector<1x32xf32>
    %238 = arith.divf %236, %237 : vector<1x32xf32>
    %c0_115 = arith.constant 0 : index
    %c0_116 = arith.constant 0 : index
    %239 = vector.load %arg5[%c0_115, %c0_116] : memref<1x32xf32, #tpu.memory_space<vmem>>, vector<1x32xf32>
    tpu.vector_store %arg5[%c0_115, %c0_116], %238 {strides = array<i32>} : memref<1x32xf32, #tpu.memory_space<vmem>>, vector<1x32xf32>,
    return
  }
}

</mosaic_0001>

<bundles_post_ra>
// kernel: voxel_gnn_discriminator.1
= control target key start
LH: loop header
LB: loop body
LE: loop exit
PB: predicated region body
PF: predicated region fallthrough
CT: control target
= control target key end

     0   :  { %s4435_s0 = inlined_call_operand.vmem [shape: f32[8,9], index: 0, kind: input, shape index: {}]   ;;  %s4436_s1 = inlined_call_operand.vmem [shape: f32[32,17], index: 1, kind: input, shape index: {}]   ;;  %s4437_s2 = inlined_call_operand.vmem [shape: f32[64,2], index: 2, kind: input, shape index: {}]   ;;  %s4438_s3 = inlined_call_operand.vmem [shape: f32[9,64,32], index: 3, kind: input, shape index: {}]   ;;  %s4439_s4 = inlined_call_operand.vmem [shape: f32[23,32], index: 4, kind: input, shape index: {}]   ;;  %s4440_s5 = inlined_call_operand.hbm [shape: f32[1,32], index: 5, kind: output, shape index: {}]  }
   0x1   :  { %v21_v0 = vld [vmem:[%s4435_s0] sm:$0xff] }
   0x2   :  { %10 = vsyncpa [#allocation4], 0  ;;  %v3863_v1 = vmov 8   ;;  %v3864_v2 = vmov 0.0   ;;  %vm3865_vm0 = vmmov 0   ;;  %v37_v3 = vlaneseq  ;;  %v22_v16 = vld [vmem:[%s4436_s1] sm:$0xff] }
   0x3   :  { %3817 = vset.pattern.permute.xlu0 %v3863_v1  ;;  %3272 = vmatprep.subr.mxu1 %v3864_v2  ;;  %vm341_vm2 = vcmask 64512   ;;  %v3866_v9 = vmov 1.0   ;;  %v3867_v10 = vmov 0   ;;  %v3868_v17 = vmov 16   ;;  %v23_v18 = vld [vmem:[%s4436_s1 + $0x8] sm:$0xff]  ;;  %v24_v20 = vld [vmem:[%s4436_s1 + $0x10] sm:$0xff] }
   0x4   :  { %42 = vperm.xlu0 %3817, %v21_v0   ;;  %3273 = vmatpush3.msra.mxu1 %v21_v0  ;;  %v38_v4 = vand.u32 127, %v37_v3  ;;  %v25_v21 = vld [vmem:[%s4436_s1 + $0x18] sm:$0xff]  ;;  %s3869_s27 = smov 8   ;;  %v3870_v22 = vmov 1   ;;  %v28_v23 = vld [vmem:[%s4437_s2 + $0x10] sm:$0xff]  ;;  %v31_v24 = vld [vmem:[%s4437_s2 + $0x28] sm:$0xff] }
   0x5   :  { %3277 = vmatprep.subr.mxu1 %v3864_v2  ;;  %3274 = vmatprep.mubr.msk.f32.mxu1 %vm3865_vm0, %v3864_v2  ;;  %v26_v25 = vld [vmem:[%s4437_s2] sm:$0xff]  ;;  %v33_v26 = vld [vmem:[%s4437_s2 + $0x38] sm:$0xff]  ;;  %v27_v27 = vld [vmem:[%s4437_s2 + $0x8] sm:$0xff]  ;;  %vm500_vm4 = vcmask 31744   ;;  %vm513_vm6 = vcmask 1043456   ;;  %s3872_s20 = smov 32  }
   0x6   :  { %v3913_v5 = vcvt.s32.f32 %v38_v4  ;;  %3818 = vset.pattern.permute.xlu1 %v3867_v10  ;;  %v29_v28 = vld [vmem:[%s4437_s2 + $0x18] sm:$0xff]  ;;  %v30_v29 = vld [vmem:[%s4437_s2 + $0x20] sm:$0xff]  ;;  %v32_v30 = vld [vmem:[%s4437_s2 + $0x30] sm:$0xff] }
   0x7   :  { %v627_v44 = vld [vmem:[%s4438_s3] sm:$0xff]  ;;  %v628_v45 = vld [vmem:[%s4438_s3 + $0x8] sm:$0xff]  ;;  %v629_v48 = vld [vmem:[%s4438_s3 + $0x10] sm:$0xff] }
   0x8   :  { %v3617_v46 = vpack.c.bf16 %v628_v45, %v627_v44  ;;  %v2955_v52 = vld [vmem:[%s4438_s3 + $0x40] sm:$0xff]  ;;  %v2956_v53 = vld [vmem:[%s4438_s3 + $0x48] sm:$0xff] }
   0x9   :  { %v3992_v54 = vpack.c.bf16 %v2956_v53, %v2955_v52 }
  0x83   :  { %v43_v6 = vpop.permute.xlu0 %42 }
  0x84   :  { %vm45_vm1 = vcmp.eq.f32.partialorder %v3913_v5, %v43_v6 }
  0x85   :  { %v46_v7 = vsel %vm45_vm1, 1.0, %v3864_v2 }
  0x86   :  { %309 = vxpose.xlu0.b32.start.end [1/1] (short) (narrow) %v46_v7, 8 }
  0xaf   :  { %3824 = vset.pattern.permute.xlu0 %v3867_v10 }
  0xb0   :  { %612 = vrot.lane.b32.xlu0 %v25_v21, %s3869_s27 }
  0xb4   :  { %87 = vperm.xlu0 %3824, %v28_v23  }
  0xb8   :  { %102 = vperm.xlu0 %3824, %v31_v24  }
  0xbc   :  { %112 = vperm.xlu0 %3824, %v33_v26  }
 0x106   :  { %v325_v8 = vpop.trf.xlu0 }
 0x107   :  { %3275 = vmatmul.mubr.msk.f32.vlgmr.msra.gmra.mrb[0].mxu1 %vm341_vm2, %v325_v8 }
 0x108   :  { %3278 = vmatpush3.msra.mxu1 %v3866_v9  ;;  %3279 = vmatprep.mubr.msk.f32.mxu1 %vm3865_vm0, %v3864_v2 }
 0x10b   :  { %3280 = vmatmul.mubr.msk.f32.vlgmr.msra.gmra.mrb[2].mxu1 %vm341_vm2, %v325_v8 }
 0x122   :  { %v613_v7 = vpop.permute.xlu0 %612 }
 0x1da   :  { %v411_v11 = vpop.f32.mrb[0].mxu1 }
 0x1db   :  { %v3276_v12 = vpop.f32.mrb[1].mxu1 }
 0x1dc   :  { %v88_v12 = vpop.permute.xlu0 %87 }
 0x1de   :  { %v481_v13 = vpop.f32.mrb[2].mxu1 }
 0x1df   :  { %v3281_v14 = vpop.f32.mrb[3].mxu1  ;;  %v486_v15 = vmax.f32 %v481_v13, 1.0  ;;  %vm485_vm3 = vcmp.gt.f32.partialorder %v481_v13, 0.0 }
 0x1e0   :  { %v494_v19 = vsel %vm485_vm3, 1, %v3867_v10  ;;  %v103_v14 = vpop.permute.xlu0 %102 }
 0x1e1   :  { %489 = vperm.xlu1 %3818, %v486_v15   ;;  %v3871_v15 = vmov 1.0|1.0  }
 0x1e5   :  { %3819 = vset.pattern.permute.xlu1 %v3868_v17 }
 0x1e6   :  { %49 = vperm.xlu1 %3819, %v22_v16  }
 0x1ea   :  { %54 = vperm.xlu1 %3819, %v23_v18  }
 0x1ee   :  { %3820 = vset.pattern.permute.xlu1 %v3867_v10 }
 0x1ef   :  { %496 = vperm.xlu1 %3820, %v494_v19  }
 0x1f3   :  { %3821 = vset.pattern.permute.xlu1 %v3868_v17 }
 0x1f4   :  { %59 = vperm.xlu1 %3821, %v24_v20  }
 0x1f8   :  { %64 = vperm.xlu1 %3821, %v25_v21  }
 0x1fc   :  { %606 = vrot.lane.b32.xlu1 %v22_v16, %s3869_s27 }
 0x1fd   :  { %3822 = vset.pattern.permute.xlu1 %v3870_v22 }
 0x200   :  { %608 = vrot.lane.b32.xlu1 %v23_v18, %s3869_s27  ;;  %v113_v18 = vpop.permute.xlu0 %112 }
 0x204   :  { %610 = vrot.lane.b32.xlu1 %v24_v20, %s3869_s27 }
 0x208   :  { %132 = vperm.xlu1 %3822, %v26_v25  }
 0x20c   :  { %136 = vperm.xlu1 %3822, %v27_v27  }
 0x210   :  { %140 = vperm.xlu1 %3822, %v28_v23  }
 0x214   :  { %144 = vperm.xlu1 %3822, %v29_v28  }
 0x218   :  { %148 = vperm.xlu1 %3822, %v30_v29  }
 0x21c   :  { %152 = vperm.xlu1 %3822, %v31_v24  }
 0x220   :  { %156 = vperm.xlu1 %3822, %v32_v30  }
 0x224   :  { %160 = vperm.xlu1 %3822, %v33_v26  }
 0x228   :  { %3823 = vset.pattern.permute.xlu1 %v3867_v10 }
 0x229   :  { %77 = vperm.xlu1 %3823, %v26_v25  }
 0x22d   :  { %82 = vperm.xlu1 %3823, %v27_v27   ;;  %v2957_v27 = vld [vmem:[%s4438_s3 + $0x50] sm:$0xff] }
 0x231   :  { %92 = vperm.xlu1 %3823, %v29_v28   ;;  %v2958_v28 = vld [vmem:[%s4438_s3 + $0x58] sm:$0xff] }
 0x235   :  { %97 = vperm.xlu1 %3823, %v30_v29   ;;  %v3625_v29 = vpack.c.bf16 %v2958_v28, %v2957_v27 }
 0x239   :  { %107 = vperm.xlu1 %3823, %v32_v30  }
 0x260   :  { %v490_v31 = vpop.permute.xlu1 %489 }
 0x261   :  { %3825 = vrcp.f32 %v490_v31 }
 0x265   :  { %v50_v32 = vpop.permute.xlu1 %49 }
 0x266   :  { %vm67_vm5 = vcmp.eq.f32.partialorder %v3913_v5, %v50_v32 }
 0x267   :  { %v71_v33 = vsel %vm67_vm5, 1.0, %v3864_v2 }
 0x268   :  { %3284 = vmatprep.mubr.msk.f32.mxu1 %vm500_vm4, %v71_v33 }
 0x269   :  { %v55_v34 = vpop.permute.xlu1 %54 }
 0x26a   :  { %vm68_vm7 = vcmp.eq.f32.partialorder %v3913_v5, %v55_v34  ;;  %v4037_v34 = vshrl.u32 %v37_v3, 7 }
 0x26b   :  { %v3826_v35 = vpop.eup %3825  ;;  %v72_v39 = vsel %vm68_vm7, 1.0, %v3864_v2 }
 0x26c   :  { %v493_v36 = vmul.f32 %v3826_v35, %v411_v11  ;;  %v4040_v35 = vsub.s32 0, %v4037_v34  ;;  %v743_v53 = vsub.s32 1, %v4037_v34 }
 0x26e   :  { %v497_v37 = vpop.permute.xlu1 %496 }
 0x26f   :  { %vm498_vm8 = vcmp.eq.s32.totalorder %v497_v37, 1 }
 0x270   :  { %v499_v38 = vsel %vm498_vm8, %v493_v36, 0.0  ;;  %vm117_vm8 = vcmp.eq.f32.partialorder %v3913_v5, %v88_v12  ;;  %v4045_v36 = vld [vmem:[%s4439_s4] sm:$0xff]  ;;  %v2969_v12 = vld [vmem:[%s4438_s3 + $0x90] sm:$0xff] }
 0x271   :  { %3282 = vmatprep.subr.msk.mxu1 %vm513_vm6, %v499_v38  ;;  %v633_v37 = vrot.slane %v4045_v36, %v4040_v35 }
 0x272   :  { %3283 = vmatpush3.msk.msra.mxu1 %vm513_vm6, %v499_v38 }
 0x273   :  { %3285 = vmatmul.mubr.msk.f32.vlgmr.msra.gmra.mrb[4].mxu1 %vm500_vm4, %v72_v39  ;;  %v60_v40 = vpop.permute.xlu1 %59  ;;  %3618 = vmatprep.subr.bf16.mxu1 %v3617_v46 }
 0x274   :  { %vm69_vm9 = vcmp.eq.f32.partialorder %v3913_v5, %v60_v40  ;;  %3620 = vmatpush3.bf16.msra.mxu1 %v3617_v46 }
 0x275   :  { %v73_v41 = vsel %vm69_vm9, 1.0, %v3864_v2  ;;  %3294 = vmatprep.subr.mxu1 %v629_v48 }
 0x276   :  { %3287 = vmatprep.mubr.msk.f32.mxu1 %vm500_vm4, %v73_v41 }
 0x277   :  { %v65_v42 = vpop.permute.xlu1 %64 }
 0x278   :  { %vm70_vm10 = vcmp.eq.f32.partialorder %v3913_v5, %v65_v42  ;;  %3295 = vmatpush3.msra.mxu1 %v629_v48 }
 0x279   :  { %v74_v43 = vsel %vm70_vm10, 1.0, %v3864_v2  ;;  %3622 = vmatprep.subr.bf16.mxu1 %v3992_v54 }
 0x27a   :  { %3288 = vmatmul.mubr.msk.f32.gmra.mrb[6].mxu1 %vm500_vm4, %v74_v43 }
 0x27b   :  { %v3976_v47 = vpop.permute.xlu1 %606 }
 0x27f   :  { %v3981_v49 = vpop.permute.xlu1 %608 }
 0x283   :  { %v3983_v50 = vpop.permute.xlu1 %610 }
 0x287   :  { %v133_v51 = vpop.permute.xlu1 %132 }
 0x288   :  { %vm163_vm11 = vcmp.eq.f32.partialorder %v3913_v5, %v133_v51 }
 0x289   :  { %v171_v55 = vsel %vm163_vm11, 1.0, %v3864_v2  ;;  %vm120_vm11 = vcmp.eq.f32.partialorder %v3913_v5, %v103_v14 }
 0x28a   :  { %179 = vxpose.xlu1.b32.start [1/8] (short) (narrow) %v171_v55, 32 }
 0x28b   :  { %v137_v56 = vpop.permute.xlu1 %136 }
 0x28c   :  { %vm164_vm12 = vcmp.eq.f32.partialorder %v3913_v5, %v137_v56 }
 0x28d   :  { %v172_v57 = vsel %vm164_vm12, 1.0, %v3864_v2 }
 0x28e   :  { %180 = vxpose.xlu1.b32.cont [2/8] (short) (narrow) %v172_v57, 32 }
 0x28f   :  { %v141_v58 = vpop.permute.xlu1 %140 }
 0x290   :  { %vm165_vm13 = vcmp.eq.f32.partialorder %v3913_v5, %v141_v58 }
 0x291   :  { %v173_v59 = vsel %vm165_vm13, 1.0, %v3864_v2 }
 0x292   :  { %181 = vxpose.xlu1.b32.cont [3/8] (short) (narrow) %v173_v59, 32 }
 0x293   :  { %v145_v60 = vpop.permute.xlu1 %144 }
 0x294   :  { %vm166_vm14 = vcmp.eq.f32.partialorder %v3913_v5, %v145_v60 }
 0x295   :  { %v174_v61 = vsel %vm166_vm14, 1.0, %v3864_v2  ;;  %vm122_vm14 = vcmp.eq.f32.partialorder %v3913_v5, %v113_v18  ;;  %v2973_v18 = vld [vmem:[%s4438_s3 + $0xb0] sm:$0xff] }
 0x296   :  { %182 = vxpose.xlu1.b32.cont [4/8] (short) (narrow) %v174_v61, 32 }
 0x297   :  { %v149_v62 = vpop.permute.xlu1 %148 }
 0x298   :  { %vm167_vm15 = vcmp.eq.f32.partialorder %v3913_v5, %v149_v62 }
 0x299   :  { %v175_v63 = vsel %vm167_vm15, 1.0, %v3864_v2 }
 0x29a   :  { %183 = vxpose.xlu1.b32.cont [5/8] (short) (narrow) %v175_v63, 32 }
 0x29b   :  { %v153_v0 = vpop.permute.xlu1 %152 }
 0x29c   :  { %vm168_vm1 = vcmp.eq.f32.partialorder %v3913_v5, %v153_v0 }
 0x29d   :  { %v176_v1 = vsel %vm168_vm1, 1.0, %v3864_v2 }
 0x29e   :  { %184 = vxpose.xlu1.b32.cont [6/8] (short) (narrow) %v176_v1, 32 }
 0x29f   :  { %v157_v4 = vpop.permute.xlu1 %156 }
 0x2a0   :  { %vm169_vm3 = vcmp.eq.f32.partialorder %v3913_v5, %v157_v4 }
 0x2a1   :  { %v177_v6 = vsel %vm169_vm3, 1.0, %v3864_v2  ;;  %vm618_vm3 = vcmask 195648  }
 0x2a2   :  { %185 = vxpose.xlu1.b32.cont [7/8] (short) (narrow) %v177_v6, 32 }
 0x2a3   :  { %v161_v8 = vpop.permute.xlu1 %160 }
 0x2a4   :  { %vm170_vm4 = vcmp.eq.f32.partialorder %v3913_v5, %v161_v8  ;;  %v2967_v8 = vld [vmem:[%s4438_s3 + $0x80] sm:$0xff] }
 0x2a5   :  { %v178_v10 = vsel %vm170_vm4, 1.0, %v3864_v2  ;;  %vm634_vm4 = vcmask 195584  }
 0x2a6   :  { %186 = vxpose.xlu1.b32.end [8/8] (short) (narrow) %v178_v10, 32  ;;  %v2968_v10 = vld [vmem:[%s4438_s3 + $0x88] sm:$0xff] }
 0x2a8   :  { %v78_v11 = vpop.permute.xlu1 %77 }
 0x2a9   :  { %vm115_vm5 = vcmp.eq.f32.partialorder %v3913_v5, %v78_v11  ;;  %v3637_v11 = vpack.c.bf16 %v2968_v10, %v2967_v8 }
 0x2ac   :  { %v83_v13 = vpop.permute.xlu1 %82 }
 0x2ad   :  { %vm116_vm6 = vcmp.eq.f32.partialorder %v3913_v5, %v83_v13  ;;  %v2970_v13 = vld [vmem:[%s4438_s3 + $0x98] sm:$0xff] }
 0x2ae   :  { %vm3601_vm7 = vmpackc.low %vm116_vm6, %vm115_vm5  ;;  %vm745_vm5 = vcmask 261120   ;;  %v3641_v14 = vpack.c.bf16 %v2970_v13, %v2969_v12  ;;  %vm964_vm6 = vcmask 523520   ;;  %v4133_v13 = vsub.s32 3, %v4037_v34 }
 0x2af   :  { %3602 = vmatprep.subr.msk.bf16.mxu0 %vm3601_vm7, %v3871_v15 }
 0x2b0   :  { %3604 = vmatpush3.bf16.msk.msra.mxu0 %vm3601_vm7, %v3871_v15  ;;  %v93_v16 = vpop.permute.xlu1 %92  ;;  %vm2916_vm7 = vcmask 253952  }
 0x2b1   :  { %vm118_vm9 = vcmp.eq.f32.partialorder %v3913_v5, %v93_v16  ;;  %v2972_v16 = vld [vmem:[%s4438_s3 + $0xa8] sm:$0xff] }
 0x2b2   :  { %vm3605_vm10 = vmpackc.low %vm118_vm9, %vm117_vm8 }
 0x2b3   :  { %3606 = vmatprep.subr.msk.bf16.mxu0 %vm3605_vm10, %v3871_v15 }
 0x2b4   :  { %3608 = vmatpush3.bf16.msk.msra.mxu0 %vm3605_vm10, %v3871_v15  ;;  %v98_v17 = vpop.permute.xlu1 %97 }
 0x2b5   :  { %vm119_vm12 = vcmp.eq.f32.partialorder %v3913_v5, %v98_v17 }
 0x2b6   :  { %vm3609_vm13 = vmpackc.low %vm120_vm11, %vm119_vm12 }
 0x2b7   :  { %3610 = vmatprep.subr.msk.bf16.mxu0 %vm3609_vm13, %v3871_v15 }
 0x2b8   :  { %3612 = vmatpush3.bf16.msk.msra.mxu0 %vm3609_vm13, %v3871_v15  ;;  %v108_v19 = vpop.permute.xlu1 %107 }
 0x2b9   :  { %vm121_vm15 = vcmp.eq.f32.partialorder %v3913_v5, %v108_v19  ;;  %v2974_v19 = vld [vmem:[%s4438_s3 + $0xb8] sm:$0xff] }
 0x2ba   :  { %vm3613_vm1 = vmpackc.low %vm122_vm14, %vm121_vm15 }
 0x2bb   :  { %3614 = vmatprep.subr.msk.bf16.mxu0 %vm3613_vm1, %v3871_v15 }
 0x2bc   :  { %3616 = vmatpush3.bf16.msk.msra.mxu0 %vm3613_vm1, %v3871_v15  ;;  %v2971_v15 = vld [vmem:[%s4438_s3 + $0xa0] sm:$0xff] }
 0x2bd   :  { %3638 = vmatprep.subr.bf16.mxu0 %v3637_v11  ;;  %v3645_v17 = vpack.c.bf16 %v2972_v16, %v2971_v15 }
 0x30a   :  { %v195_v30 = vpop.trf.xlu1 }
 0x30e   :  { %v196_v31 = vpop.trf.xlu1 }
 0x312   :  { %v197_v32 = vpop.trf.xlu1 }
 0x316   :  { %v198_v33 = vpop.trf.xlu1 }
 0x346   :  { %v3286_v20 = vpop.f32.mrb[4].mxu1 }
 0x347   :  { %603 = vst.msk [vmem:[#allocation2 + $0x8] sm:$0xff] %vm341_vm2, %v3286_v20  ;;  %v583_v21 = vpop.f32.mrb[5].mxu1  ;;  %v3649_v20 = vpack.c.bf16 %v2974_v19, %v2973_v18 }
 0x348   :  { %602 = vst.msk [vmem:[#allocation2] sm:$0xff] %vm341_vm2, %v583_v21 }
 0x349   :  { %620 = vst.msk [vmem:[#allocation2 + $0x8] sm:$0xff] %vm618_vm3, %v3981_v49  ;;  %619 = vst.msk [vmem:[#allocation2] sm:$0xff] %vm618_vm3, %v3976_v47 }
 0x34d   :  { %v3289_v22 = vpop.f32.mrb[6].mxu1 }
 0x34e   :  { %605 = vst.msk [vmem:[#allocation2 + $0x18] sm:$0xff] %vm341_vm2, %v3289_v22  ;;  %v593_v23 = vpop.f32.mrb[7].mxu1 }
 0x34f   :  { %604 = vst.msk [vmem:[#allocation2 + $0x10] sm:$0xff] %vm341_vm2, %v593_v23  ;;  %vm211_vm2 = vcmask 523264  }
 0x350   :  { %622 = vst.msk [vmem:[#allocation2 + $0x18] sm:$0xff] %vm618_vm3, %v613_v7  ;;  %v624_v5 = vld [vmem:[#allocation2 + $0x8] sm:$0xff]  ;;  %621 = vst.msk [vmem:[#allocation2 + $0x10] sm:$0xff] %vm618_vm3, %v3983_v50  ;;  %v623_v24 = vld [vmem:[#allocation2] sm:$0xff]  ;;  %3266 = vmatprep.mubr.msk.f32.mxu0 %vm211_vm2, %v195_v30 }
 0x351   :  { %3296 = vmatprep.mubr.msk.f32.mxu1 %vm634_vm4, %v623_v24  ;;  %3267 = vmatmul.mubr.msk.f32.vlgmr.msra.gmra.mrb[0].mxu0 %vm211_vm2, %v196_v31 }
 0x352   :  { %3297 = vmatmul.mubr.msk.f32.vlgmr.msra.gmra.mrb[8].mxu1 %vm634_vm4, %v624_v5  ;;  %3269 = vmatprep.mubr.msk.f32.mxu0 %vm211_vm2, %v197_v32  ;;  %v3873_v32 = vmov 0.0|0.0  }
 0x353   :  { %3624 = vmatpush3.bf16.msra.mxu1 %v3992_v54  ;;  %v744_v54 = vrot.slane %v4045_v36, %v743_v53  ;;  %3640 = vmatpush3.bf16.msra.mxu0 %v3637_v11 }
 0x354   :  { %3626 = vmatprep.subr.bf16.mxu1 %v3625_v29  ;;  %3642 = vmatprep.subr.bf16.mxu0 %v3641_v14 }
 0x355   :  { %3270 = vmatmul.mubr.msk.f32.gmra.mrb[2].mxu0 %vm211_vm2, %v198_v33  ;;  %v4117_v33 = vsub.s32 2, %v4037_v34 }
 0x357   :  { %v626_v25 = vld [vmem:[#allocation2 + $0x18] sm:$0xff]  ;;  %v625_v26 = vld [vmem:[#allocation2 + $0x10] sm:$0xff]  ;;  %3628 = vmatpush3.bf16.msra.mxu1 %v3625_v29  ;;  %3644 = vmatpush3.bf16.msra.mxu0 %v3641_v14  ;;  %v4136_v14 = vsub.s32 4, %v4037_v34 }
 0x358   :  { %3299 = vmatprep.mubr.msk.f32.mxu1 %vm634_vm4, %v625_v26  ;;  %3646 = vmatprep.subr.bf16.mxu0 %v3645_v17 }
 0x359   :  { %3300 = vmatmul.mubr.msk.f32.gmra.mrb[10].mxu1 %vm634_vm4, %v626_v25 }
 0x35b   :  { %3648 = vmatpush3.bf16.msra.mxu0 %v3645_v17  ;;  %v1261_v17 = vrot.slane %v4045_v36, %v4136_v14 }
 0x35c   :  { %3650 = vmatprep.subr.bf16.mxu0 %v3649_v20 }
 0x35f   :  { %3652 = vmatpush3.bf16.msra.mxu0 %v3649_v20 }
 0x424   :  { %v4053_v49 = vpop.f32.mrb[0].mxu0 }
 0x425   :  { %v3298_v38 = vpop.f32.mrb[8].mxu1  ;;  %v4055_v50 = vpop.f32.mrb[1].mxu0 }
 0x426   :  { %v719_v39 = vadd.f32 %v3298_v38, %v633_v37  ;;  %v713_v40 = vpop.f32.mrb[9].mxu1 }
 0x427   :  { %v714_v41 = vadd.f32 %v713_v40, %v633_v37 }
 0x428   :  { %v733_v42 = vmax.f32 %v719_v39, 0.0  ;;  %v4059_v51 = vpop.f32.mrb[2].mxu0 }
 0x429   :  { %v732_v43 = vmax.f32 %v714_v41, 0.0  ;;  %v4061_v52 = vpop.f32.mrb[3].mxu0 }
 0x42b   :  { %3310 = vmatprep.mubr.msk.f32.mxu1 %vm745_vm5, %v732_v43 }
 0x42c   :  { %v3301_v3 = vpop.f32.mrb[10].mxu1  ;;  %3311 = vmatmul.mubr.msk.f32.vlgmr.msra.gmra.mrb[12].mxu1 %vm745_vm5, %v733_v42 }
 0x42d   :  { %v729_v44 = vadd.f32 %v3301_v3, %v633_v37  ;;  %v723_v45 = vpop.f32.mrb[11].mxu1 }
 0x42e   :  { %v724_v46 = vadd.f32 %v723_v45, %v633_v37  ;;  %v985_v37 = vrot.slane %v4045_v36, %v4117_v33 }
 0x42f   :  { %v735_v48 = vmax.f32 %v729_v44, 0.0 }
 0x430   :  { %v734_v47 = vmax.f32 %v724_v46, 0.0 }
 0x432   :  { %3313 = vmatprep.mubr.msk.f32.mxu1 %vm745_vm5, %v734_v47  ;;  %v1158_v47 = vrot.slane %v4045_v36, 5 }
 0x433   :  { %3314 = vmatmul.mubr.msk.f32.gmra.mrb[14].mxu1 %vm745_vm5, %v735_v48 }
 0x434   :  { %3324 = vmatprep.mubr.msk.f32.mxu1 %vm745_vm5, %v4055_v50 }
 0x4ff   :  { %v3312_v55 = vpop.f32.mrb[12].mxu1 }
 0x500   :  { %v830_v56 = vadd.f32 %v3312_v55, %v744_v54  ;;  %v824_v57 = vpop.f32.mrb[13].mxu1 }
 0x501   :  { %v825_v58 = vadd.f32 %v824_v57, %v744_v54 }
 0x502   :  { %v844_v59 = vmax.f32 %v830_v56, 0.0 }
 0x503   :  { %v843_v60 = vmax.f32 %v825_v58, 0.0 }
 0x504   :  { %945 = vst.msk [vmem:[#allocation2 + $0x8] sm:$0xff] %vm745_vm5, %v844_v59 }
 0x505   :  { %v3629_v61 = vpack.c.bf16 %v844_v59, %v843_v60  ;;  %944 = vst.msk [vmem:[#allocation2] sm:$0xff] %vm745_vm5, %v843_v60 }
 0x506   :  { %v3315_v62 = vpop.f32.mrb[14].mxu1 }
 0x507   :  { %v840_v63 = vadd.f32 %v3315_v62, %v744_v54  ;;  %v834_v0 = vpop.f32.mrb[15].mxu1  ;;  %3630 = vmatprep.subr.bf16.mxu1 %v3629_v61 }
 0x508   :  { %v835_v1 = vadd.f32 %v834_v0, %v744_v54  ;;  %3632 = vmatpush3.bf16.msra.mxu1 %v3629_v61 }
 0x509   :  { %v846_v4 = vmax.f32 %v840_v63, 0.0 }
 0x50a   :  { %v845_v6 = vmax.f32 %v835_v1, 0.0 }
 0x50b   :  { %947 = vst.msk [vmem:[#allocation2 + $0x18] sm:$0xff] %vm745_vm5, %v846_v4 }
 0x50c   :  { %v3633_v7 = vpack.c.bf16 %v846_v4, %v845_v6  ;;  %946 = vst.msk [vmem:[#allocation2 + $0x10] sm:$0xff] %vm745_vm5, %v845_v6 }
 0x50e   :  { %3634 = vmatprep.subr.bf16.mxu1 %v3633_v7 }
 0x50f   :  { %3636 = vmatpush3.bf16.msra.mxu1 %v3633_v7 }
 0x510   :  { %3653 = vmatprep.subr.bf16.mxu1 %v3873_v32 }
 0x512   :  { %3325 = vmatmul.mubr.msk.f32.vlgmr.msra.gmra.mrb[16].mxu1 %vm745_vm5, %v4053_v49 }
 0x513   :  { %3327 = vmatprep.mubr.msk.f32.mxu1 %vm745_vm5, %v4061_v52 }
 0x516   :  { %3328 = vmatmul.mubr.msk.f32.gmra.mrb[18].mxu1 %vm745_vm5, %v4059_v51 }
 0x517   :  { %3360 = vmatprep.mubr.msk.f32.mxu1 %vm3865_vm0, %v3864_v2 }
 0x5e5   :  { %v3326_v21 = vpop.f32.mrb[16].mxu1 }
 0x5e6   :  { %954 = vrot.lane.b32.xlu0 %v3326_v21, %s3872_s20  ;;  %v925_v22 = vpop.f32.mrb[17].mxu1 }
 0x5e9   :  { %v3329_v23 = vpop.f32.mrb[18].mxu1 }
 0x5ea   :  { %952 = vrot.lane.b32.xlu0 %v925_v22, %s3872_s20  ;;  %v935_v5 = vpop.f32.mrb[19].mxu1 }
 0x5ee   :  { %956 = vrot.lane.b32.xlu0 %v935_v5, %s3872_s20 }
 0x5f2   :  { %958 = vrot.lane.b32.xlu0 %v3329_v23, %s3872_s20 }
 0x658   :  { %v955_v24 = vpop.permute.xlu0 %954 }
 0x659   :  { %966 = vst.msk [vmem:[#allocation2 + $0x8] sm:$0xff] %vm964_vm6, %v955_v24 }
 0x65c   :  { %v953_v25 = vpop.permute.xlu0 %952 }
 0x65d   :  { %965 = vst.msk [vmem:[#allocation2] sm:$0xff] %vm964_vm6, %v953_v25 }
 0x660   :  { %v957_v26 = vpop.permute.xlu0 %956  ;;  %v970_v29 = vld [vmem:[#allocation2 + $0x8] sm:$0xff] }
 0x661   :  { %967 = vst.msk [vmem:[#allocation2 + $0x10] sm:$0xff] %vm964_vm6, %v957_v26 }
 0x664   :  { %v959_v27 = vpop.permute.xlu0 %958  ;;  %v969_v28 = vld [vmem:[#allocation2] sm:$0xff] }
 0x665   :  { %968 = vst.msk [vmem:[#allocation2 + $0x18] sm:$0xff] %vm964_vm6, %v959_v27  ;;  %3346 = vmatprep.mubr.msk.f32.mxu0 %vm211_vm2, %v969_v28 }
 0x666   :  { %3347 = vmatmul.mubr.msk.f32.vlgmr.msra.gmra.mrb[4].mxu0 %vm211_vm2, %v970_v29 }
 0x668   :  { %v971_v30 = vld [vmem:[#allocation2 + $0x10] sm:$0xff] }
 0x669   :  { %3349 = vmatprep.mubr.msk.f32.mxu0 %vm211_vm2, %v971_v30 }
 0x66c   :  { %v972_v31 = vld [vmem:[#allocation2 + $0x18] sm:$0xff] }
 0x66d   :  { %3350 = vmatmul.mubr.msk.f32.gmra.mrb[6].mxu0 %vm211_vm2, %v972_v31  ;;  %v2985_v31 = vld [vmem:[%s4438_s3 + $0xc0] sm:$0xff] }
 0x66e   :  { %3382 = vmatprep.mubr.msk.f32.mxu0 %vm745_vm5, %v4055_v50 }
 0x739   :  { %v3348_v38 = vpop.f32.mrb[4].mxu0 }
 0x73a   :  { %v1070_v39 = vadd.f32 %v3348_v38, %v985_v37  ;;  %v1064_v40 = vpop.f32.mrb[5].mxu0 }
 0x73b   :  { %v1065_v41 = vadd.f32 %v1064_v40, %v985_v37  ;;  %v2988_v40 = vld [vmem:[%s4438_s3 + $0xd8] sm:$0xff] }
 0x73d   :  { %v3654_v42 = vpack.c.bf16 %v1070_v39, %v1065_v41 }
 0x73f   :  { %3655 = vmatpush3.bf16.msra.mxu1 %v3654_v42  ;;  %v2989_v42 = vld [vmem:[%s4438_s3 + $0xe0] sm:$0xff] }
 0x740   :  { %v3351_v43 = vpop.f32.mrb[6].mxu0  ;;  %3656 = vmatprep.subr.bf16.mxu1 %v3873_v32 }
 0x741   :  { %v1080_v3 = vadd.f32 %v3351_v43, %v985_v37  ;;  %v1074_v44 = vpop.f32.mrb[7].mxu0  ;;  %v2990_v43 = vld [vmem:[%s4438_s3 + $0xe8] sm:$0xff] }
 0x742   :  { %v1075_v45 = vadd.f32 %v1074_v44, %v985_v37  ;;  %v2986_v37 = vld [vmem:[%s4438_s3 + $0xc8] sm:$0xff]  ;;  %v2991_v44 = vld [vmem:[%s4438_s3 + $0xf0] sm:$0xff] }
 0x743   :  { %v3673_v38 = vpack.c.bf16 %v2986_v37, %v2985_v31 }
 0x744   :  { %v3657_v46 = vpack.c.bf16 %v1080_v3, %v1075_v45 }
 0x746   :  { %3658 = vmatpush3.bf16.msra.mxu1 %v3657_v46 }
 0x747   :  { %3659 = vmatprep.subr.bf16.mxu1 %v3873_v32 }
 0x749   :  { %3361 = vmatmul.mubr.msk.f32.vlgmr.msra.gmra.mrb[20].mxu1 %vm745_vm5, %v3866_v9 }
 0x74a   :  { %3371 = vmatprep.mubr.msk.f32.mxu1 %vm3865_vm0, %v3864_v2 }
 0x81c   :  { %v1152_v48 = vpop.f32.mrb[20].mxu1 }
 0x81d   :  { %v1156_v53 = vmul.f32 0.03125, %v1152_v48  ;;  %v3362_v54 = vpop.f32.mrb[21].mxu1 }
 0x81f   :  { %v1160_v55 = vmul.f32 %v1158_v47, %v1156_v53 }
 0x821   :  { %v1164_v56 = vrot.slane %v1160_v55, %v4040_v35 }
 0x823   :  { %v1165_v57 = vsub.f32 %v1065_v41, %v1164_v56  ;;  %v1166_v58 = vsub.f32 %v1070_v39, %v1164_v56  ;;  %v1167_v59 = vsub.f32 %v1075_v45, %v1164_v56  ;;  %v1168_v60 = vsub.f32 %v1080_v3, %v1164_v56  ;;  %v2987_v39 = vld [vmem:[%s4438_s3 + $0xd0] sm:$0xff]  ;;  %v2992_v45 = vld [vmem:[%s4438_s3 + $0xf8] sm:$0xff] }
 0x824   :  { %v3677_v41 = vpack.c.bf16 %v2988_v40, %v2987_v39  ;;  %v3681_v3 = vpack.c.bf16 %v2990_v43, %v2989_v42  ;;  %v3685_v46 = vpack.c.bf16 %v2992_v45, %v2991_v44 }
 0x825   :  { %v1169_v61 = vmul.f32 %v1165_v57, %v1165_v57  ;;  %v1170_v62 = vmul.f32 %v1166_v58, %v1166_v58  ;;  %v1171_v0 = vmul.f32 %v1167_v59, %v1167_v59  ;;  %v1172_v1 = vmul.f32 %v1168_v60, %v1168_v60 }
 0x827   :  { %v3660_v63 = vpack.c.bf16 %v1170_v62, %v1169_v61  ;;  %v3663_v4 = vpack.c.bf16 %v1172_v1, %v1171_v0 }
 0x829   :  { %3661 = vmatpush3.bf16.msra.mxu1 %v3660_v63  ;;  %v1394_v63 = vsub.s32 6, %v4037_v34 }
 0x82a   :  { %3662 = vmatprep.subr.bf16.mxu1 %v3873_v32 }
 0x82b   :  { %v1395_v0 = vrot.slane %v4045_v36, %v1394_v63 }
 0x82d   :  { %3664 = vmatpush3.bf16.msra.mxu1 %v3663_v4 }
 0x82e   :  { %3674 = vmatprep.subr.bf16.mxu1 %v3673_v38 }
 0x830   :  { %3372 = vmatmul.mubr.msk.f32.vlgmr.msra.gmra.mrb[22].mxu1 %vm745_vm5, %v3866_v9 }
 0x831   :  { %3676 = vmatpush3.bf16.msra.mxu1 %v3673_v38 }
 0x832   :  { %3678 = vmatprep.subr.bf16.mxu1 %v3677_v41 }
 0x835   :  { %3680 = vmatpush3.bf16.msra.mxu1 %v3677_v41 }
 0x836   :  { %3682 = vmatprep.subr.bf16.mxu1 %v3681_v3 }
 0x839   :  { %3684 = vmatpush3.bf16.msra.mxu1 %v3681_v3  ;;  %v1659_v3 = vsub.s32 7, %v4037_v34 }
 0x83a   :  { %3686 = vmatprep.subr.bf16.mxu1 %v3685_v46 }
 0x83d   :  { %3688 = vmatpush3.bf16.msra.mxu1 %v3685_v46 }
 0x903   :  { %v1239_v6 = vpop.f32.mrb[22].mxu1 }
 0x904   :  { %v1243_v7 = vmul.f32 0.03125, %v1239_v6  ;;  %v3373_v8 = vpop.f32.mrb[23].mxu1 }
 0x906   :  { %v1244_v10 = vadd.f32 1e-05, %v1243_v7 }
 0x908   :  { %3827 = vrsqrt.f32 %v1244_v10 }
 0x912   :  { %v3828_v11 = vpop.eup %3827 }
 0x913   :  { %v1247_v12 = vrot.slane %v3828_v11, 5 }
 0x915   :  { %v1249_v15 = vmul.f32 %v1247_v12, %v4045_v36 }
 0x917   :  { %v1253_v16 = vrot.slane %v1249_v15, %v4133_v13 }
 0x919   :  { %v1254_v18 = vmul.f32 %v1253_v16, %v1165_v57  ;;  %v1255_v19 = vmul.f32 %v1253_v16, %v1166_v58  ;;  %v1256_v20 = vmul.f32 %v1253_v16, %v1167_v59  ;;  %v1257_v21 = vmul.f32 %v1253_v16, %v1168_v60 }
 0x91b   :  { %v1262_v22 = vadd.f32 %v1261_v17, %v1254_v18  ;;  %v1263_v23 = vadd.f32 %v1261_v17, %v1255_v19  ;;  %v1264_v5 = vadd.f32 %v1261_v17, %v1256_v20  ;;  %v1265_v24 = vadd.f32 %v1261_v17, %v1257_v21  ;;  %v4206_v17 = vld [vmem:[%s4439_s4 + $0x8] sm:$0xff] }
 0x91c   :  { %v1565_v18 = vrot.slane %v4206_v17, 1  ;;  %v1668_v46 = vrot.slane %v4206_v17, %v4040_v35 }
 0x91d   :  { %v1266_v25 = vmax.f32 %v1262_v22, 0.0  ;;  %v1267_v26 = vmax.f32 %v1263_v23, 0.0  ;;  %v1268_v27 = vmax.f32 %v1264_v5, 0.0  ;;  %v1269_v28 = vmax.f32 %v1265_v24, 0.0 }
 0x91f   :  { %v3665_v29 = vpack.c.bf16 %v1267_v26, %v1266_v25  ;;  %1355 = vst.msk [vmem:[#allocation2] sm:$0xff] %vm745_vm5, %v1266_v25  ;;  %1356 = vst.msk [vmem:[#allocation2 + $0x8] sm:$0xff] %vm745_vm5, %v1267_v26  ;;  %v3669_v30 = vpack.c.bf16 %v1269_v28, %v1268_v27 }
 0x920   :  { %1357 = vst.msk [vmem:[#allocation2 + $0x10] sm:$0xff] %vm745_vm5, %v1268_v27  ;;  %1358 = vst.msk [vmem:[#allocation2 + $0x18] sm:$0xff] %vm745_vm5, %v1269_v28 }
 0x921   :  { %3666 = vmatprep.subr.bf16.mxu0 %v3665_v29 }
 0x922   :  { %3668 = vmatpush3.bf16.msra.mxu0 %v3665_v29 }
 0x923   :  { %3670 = vmatprep.subr.bf16.mxu0 %v3669_v30 }
 0x926   :  { %3672 = vmatpush3.bf16.msra.mxu0 %v3669_v30 }
 0x927   :  { %3689 = vmatprep.subr.bf16.mxu0 %v3873_v32 }
 0x929   :  { %3383 = vmatmul.mubr.msk.f32.vlgmr.msra.gmra.mrb[8].mxu0 %vm745_vm5, %v4053_v49 }
 0x92a   :  { %3385 = vmatprep.mubr.msk.f32.mxu0 %vm745_vm5, %v4061_v52 }
 0x92d   :  { %3386 = vmatmul.mubr.msk.f32.gmra.mrb[10].mxu0 %vm745_vm5, %v4059_v51 }
 0x92e   :  { %3418 = vmatprep.mubr.msk.f32.mxu0 %vm3865_vm0, %v3864_v2 }
 0x9fc   :  { %v3384_v47 = vpop.f32.mrb[8].mxu0 }
 0x9fd   :  { %1365 = vrot.lane.b32.xlu0 %v3384_v47, %s3872_s20  ;;  %v1336_v48 = vpop.f32.mrb[9].mxu0 }
 0xa00   :  { %v3387_v53 = vpop.f32.mrb[10].mxu0 }
 0xa01   :  { %1363 = vrot.lane.b32.xlu0 %v1336_v48, %s3872_s20  ;;  %v1346_v54 = vpop.f32.mrb[11].mxu0 }
 0xa05   :  { %1367 = vrot.lane.b32.xlu0 %v1346_v54, %s3872_s20 }
 0xa09   :  { %1369 = vrot.lane.b32.xlu0 %v3387_v53, %s3872_s20 }
 0xa6f   :  { %v1366_v55 = vpop.permute.xlu0 %1365 }
 0xa70   :  { %1376 = vst.msk [vmem:[#allocation2 + $0x8] sm:$0xff] %vm964_vm6, %v1366_v55 }
 0xa73   :  { %v1364_v56 = vpop.permute.xlu0 %1363 }
 0xa74   :  { %1375 = vst.msk [vmem:[#allocation2] sm:$0xff] %vm964_vm6, %v1364_v56 }
 0xa77   :  { %v1368_v57 = vpop.permute.xlu0 %1367  ;;  %v1380_v60 = vld [vmem:[#allocation2 + $0x8] sm:$0xff] }
 0xa78   :  { %1377 = vst.msk [vmem:[#allocation2 + $0x10] sm:$0xff] %vm964_vm6, %v1368_v57 }
 0xa7b   :  { %v1370_v58 = vpop.permute.xlu0 %1369  ;;  %v1379_v59 = vld [vmem:[#allocation2] sm:$0xff] }
 0xa7c   :  { %1378 = vst.msk [vmem:[#allocation2 + $0x18] sm:$0xff] %vm964_vm6, %v1370_v58  ;;  %3404 = vmatprep.mubr.msk.f32.mxu1 %vm211_vm2, %v1379_v59 }
 0xa7d   :  { %3405 = vmatmul.mubr.msk.f32.vlgmr.msra.gmra.mrb[24].mxu1 %vm211_vm2, %v1380_v60 }
 0xa7f   :  { %v1381_v61 = vld [vmem:[#allocation2 + $0x10] sm:$0xff] }
 0xa80   :  { %3407 = vmatprep.mubr.msk.f32.mxu1 %vm211_vm2, %v1381_v61 }
 0xa83   :  { %v1382_v62 = vld [vmem:[#allocation2 + $0x18] sm:$0xff] }
 0xa84   :  { %3408 = vmatmul.mubr.msk.f32.gmra.mrb[26].mxu1 %vm211_vm2, %v1382_v62 }
 0xa85   :  { %3440 = vmatprep.mubr.msk.f32.mxu1 %vm745_vm5, %v4055_v50 }
 0xb50   :  { %v3406_v1 = vpop.f32.mrb[24].mxu1 }
 0xb51   :  { %v1480_v4 = vadd.f32 %v3406_v1, %v1395_v0  ;;  %v1474_v6 = vpop.f32.mrb[25].mxu1  ;;  %v3003_v1 = vld [vmem:[%s4438_s3 + $0x100] sm:$0xff] }
 0xb52   :  { %v1475_v7 = vadd.f32 %v1474_v6, %v1395_v0 }
 0xb54   :  { %v3690_v8 = vpack.c.bf16 %v1480_v4, %v1475_v7 }
 0xb56   :  { %3691 = vmatpush3.bf16.msra.mxu0 %v3690_v8  ;;  %v3006_v8 = vld [vmem:[%s4438_s3 + $0x118] sm:$0xff] }
 0xb57   :  { %v3409_v10 = vpop.f32.mrb[26].mxu1  ;;  %3692 = vmatprep.subr.bf16.mxu0 %v3873_v32 }
 0xb58   :  { %v1490_v11 = vadd.f32 %v3409_v10, %v1395_v0  ;;  %v1484_v12 = vpop.f32.mrb[27].mxu1 }
 0xb59   :  { %v1485_v15 = vadd.f32 %v1484_v12, %v1395_v0  ;;  %v3008_v12 = vld [vmem:[%s4438_s3 + $0x128] sm:$0xff] }
 0xb5b   :  { %v3693_v16 = vpack.c.bf16 %v1490_v11, %v1485_v15 }
 0xb5d   :  { %3694 = vmatpush3.bf16.msra.mxu0 %v3693_v16  ;;  %v3009_v16 = vld [vmem:[%s4438_s3 + $0x130] sm:$0xff] }
 0xb5e   :  { %3695 = vmatprep.subr.bf16.mxu0 %v3873_v32 }
 0xb60   :  { %3419 = vmatmul.mubr.msk.f32.vlgmr.msra.gmra.mrb[12].mxu0 %vm745_vm5, %v3866_v9 }
 0xb61   :  { %3429 = vmatprep.mubr.msk.f32.mxu0 %vm3865_vm0, %v3864_v2 }
 0xc33   :  { %v1559_v19 = vpop.f32.mrb[12].mxu0 }
 0xc34   :  { %v1563_v20 = vmul.f32 0.03125, %v1559_v19  ;;  %v3420_v21 = vpop.f32.mrb[13].mxu0 }
 0xc36   :  { %v1567_v22 = vmul.f32 %v1565_v18, %v1563_v20  ;;  %v3010_v18 = vld [vmem:[%s4438_s3 + $0x138] sm:$0xff] }
 0xc37   :  { %v3721_v19 = vpack.c.bf16 %v3010_v18, %v3009_v16  ;;  %v2074_v16 = vrot.slane %v4206_v17, %v4136_v14 }
 0xc38   :  { %v1571_v23 = vrot.slane %v1567_v22, %v4040_v35 }
 0xc3a   :  { %v1572_v5 = vsub.f32 %v1475_v7, %v1571_v23  ;;  %v1573_v24 = vsub.f32 %v1480_v4, %v1571_v23  ;;  %v1574_v25 = vsub.f32 %v1485_v15, %v1571_v23  ;;  %v1575_v26 = vsub.f32 %v1490_v11, %v1571_v23  ;;  %v3004_v4 = vld [vmem:[%s4438_s3 + $0x108] sm:$0xff]  ;;  %v3005_v7 = vld [vmem:[%s4438_s3 + $0x110] sm:$0xff]  ;;  %v3007_v11 = vld [vmem:[%s4438_s3 + $0x120] sm:$0xff] }
 0xc3b   :  { %v3709_v6 = vpack.c.bf16 %v3004_v4, %v3003_v1  ;;  %v3713_v10 = vpack.c.bf16 %v3006_v8, %v3005_v7  ;;  %v3717_v15 = vpack.c.bf16 %v3008_v12, %v3007_v11 }
 0xc3c   :  { %v1576_v27 = vmul.f32 %v1572_v5, %v1572_v5  ;;  %v1577_v28 = vmul.f32 %v1573_v24, %v1573_v24  ;;  %v1578_v30 = vmul.f32 %v1574_v25, %v1574_v25  ;;  %v1579_v31 = vmul.f32 %v1575_v26, %v1575_v26 }
 0xc3e   :  { %v3696_v29 = vpack.c.bf16 %v1577_v28, %v1576_v27  ;;  %v3699_v37 = vpack.c.bf16 %v1579_v31, %v1578_v30  ;;  %v1802_v31 = vrot.slane %v4206_v17, %v4117_v33 }
 0xc40   :  { %3697 = vmatpush3.bf16.msra.mxu0 %v3696_v29 }
 0xc41   :  { %3698 = vmatprep.subr.bf16.mxu0 %v3873_v32 }
 0xc44   :  { %3700 = vmatpush3.bf16.msra.mxu0 %v3699_v37 }
 0xc45   :  { %3710 = vmatprep.subr.bf16.mxu0 %v3709_v6 }
 0xc47   :  { %3430 = vmatmul.mubr.msk.f32.vlgmr.msra.gmra.mrb[14].mxu0 %vm745_vm5, %v3866_v9 }
 0xc48   :  { %3712 = vmatpush3.bf16.msra.mxu0 %v3709_v6 }
 0xc49   :  { %3714 = vmatprep.subr.bf16.mxu0 %v3713_v10 }
 0xc4c   :  { %3716 = vmatpush3.bf16.msra.mxu0 %v3713_v10 }
 0xc4d   :  { %3718 = vmatprep.subr.bf16.mxu0 %v3717_v15 }
 0xc50   :  { %3720 = vmatpush3.bf16.msra.mxu0 %v3717_v15 }
 0xc51   :  { %3722 = vmatprep.subr.bf16.mxu0 %v3721_v19 }
 0xc54   :  { %3724 = vmatpush3.bf16.msra.mxu0 %v3721_v19 }
 0xd1a   :  { %v1646_v38 = vpop.f32.mrb[14].mxu0 }
 0xd1b   :  { %v1650_v39 = vmul.f32 0.03125, %v1646_v38  ;;  %v3431_v40 = vpop.f32.mrb[15].mxu0 }
 0xd1d   :  { %v1651_v41 = vadd.f32 1e-05, %v1650_v39 }
 0xd1f   :  { %3829 = vrsqrt.f32 %v1651_v41 }
 0xd29   :  { %v3830_v42 = vpop.eup %3829 }
 0xd2a   :  { %v1654_v43 = vrot.slane %v3830_v42, 1 }
 0xd2c   :  { %v1656_v44 = vmul.f32 %v1654_v43, %v4045_v36 }
 0xd2e   :  { %v1660_v45 = vrot.slane %v1656_v44, %v1659_v3 }
 0xd30   :  { %v1661_v47 = vmul.f32 %v1660_v45, %v1572_v5  ;;  %v1662_v48 = vmul.f32 %v1660_v45, %v1573_v24  ;;  %v1663_v53 = vmul.f32 %v1660_v45, %v1574_v25  ;;  %v1664_v54 = vmul.f32 %v1660_v45, %v1575_v26 }
 0xd32   :  { %v1669_v55 = vadd.f32 %v1668_v46, %v1661_v47  ;;  %v1670_v56 = vadd.f32 %v1668_v46, %v1662_v48  ;;  %v1671_v57 = vadd.f32 %v1668_v46, %v1663_v53  ;;  %v1672_v58 = vadd.f32 %v1668_v46, %v1664_v54 }
 0xd34   :  { %v1673_v59 = vmax.f32 %v1669_v55, 0.0  ;;  %v1674_v60 = vmax.f32 %v1670_v56, 0.0  ;;  %v1675_v61 = vmax.f32 %v1671_v57, 0.0  ;;  %v1676_v62 = vmax.f32 %v1672_v58, 0.0 }
 0xd36   :  { %v3701_v0 = vpack.c.bf16 %v1674_v60, %v1673_v59  ;;  %1762 = vst.msk [vmem:[#allocation2] sm:$0xff] %vm745_vm5, %v1673_v59  ;;  %1763 = vst.msk [vmem:[#allocation2 + $0x8] sm:$0xff] %vm745_vm5, %v1674_v60  ;;  %v3705_v36 = vpack.c.bf16 %v1676_v62, %v1675_v61 }
 0xd37   :  { %1764 = vst.msk [vmem:[#allocation2 + $0x10] sm:$0xff] %vm745_vm5, %v1675_v61  ;;  %1765 = vst.msk [vmem:[#allocation2 + $0x18] sm:$0xff] %vm745_vm5, %v1676_v62 }
 0xd38   :  { %3702 = vmatprep.subr.bf16.mxu1 %v3701_v0 }
 0xd39   :  { %3704 = vmatpush3.bf16.msra.mxu1 %v3701_v0 }
 0xd3a   :  { %3706 = vmatprep.subr.bf16.mxu1 %v3705_v36 }
 0xd3d   :  { %3708 = vmatpush3.bf16.msra.mxu1 %v3705_v36 }
 0xd3e   :  { %3725 = vmatprep.subr.bf16.mxu1 %v3873_v32 }
 0xd40   :  { %3441 = vmatmul.mubr.msk.f32.vlgmr.msra.gmra.mrb[28].mxu1 %vm745_vm5, %v4053_v49 }
 0xd41   :  { %3443 = vmatprep.mubr.msk.f32.mxu1 %vm745_vm5, %v4061_v52 }
 0xd44   :  { %3444 = vmatmul.mubr.msk.f32.gmra.mrb[30].mxu1 %vm745_vm5, %v4059_v51 }
 0xd45   :  { %3476 = vmatprep.mubr.msk.f32.mxu1 %vm3865_vm0, %v3864_v2 }
 0xe13   :  { %v3442_v20 = vpop.f32.mrb[28].mxu1 }
 0xe14   :  { %1772 = vrot.lane.b32.xlu0 %v3442_v20, %s3872_s20  ;;  %v1743_v21 = vpop.f32.mrb[29].mxu1 }
 0xe17   :  { %v3445_v22 = vpop.f32.mrb[30].mxu1 }
 0xe18   :  { %1770 = vrot.lane.b32.xlu0 %v1743_v21, %s3872_s20  ;;  %v1753_v23 = vpop.f32.mrb[31].mxu1 }
 0xe1c   :  { %1774 = vrot.lane.b32.xlu0 %v1753_v23, %s3872_s20 }
 0xe20   :  { %1776 = vrot.lane.b32.xlu0 %v3445_v22, %s3872_s20 }
 0xe86   :  { %v1773_v5 = vpop.permute.xlu0 %1772 }
 0xe87   :  { %1783 = vst.msk [vmem:[#allocation2 + $0x8] sm:$0xff] %vm964_vm6, %v1773_v5 }
 0xe8a   :  { %v1771_v24 = vpop.permute.xlu0 %1770 }
 0xe8b   :  { %1782 = vst.msk [vmem:[#allocation2] sm:$0xff] %vm964_vm6, %v1771_v24 }
 0xe8e   :  { %v1775_v25 = vpop.permute.xlu0 %1774  ;;  %v1787_v28 = vld [vmem:[#allocation2 + $0x8] sm:$0xff] }
 0xe8f   :  { %1784 = vst.msk [vmem:[#allocation2 + $0x10] sm:$0xff] %vm964_vm6, %v1775_v25 }
 0xe92   :  { %v1777_v26 = vpop.permute.xlu0 %1776  ;;  %v1786_v27 = vld [vmem:[#allocation2] sm:$0xff] }
 0xe93   :  { %1785 = vst.msk [vmem:[#allocation2 + $0x18] sm:$0xff] %vm964_vm6, %v1777_v26  ;;  %3462 = vmatprep.mubr.msk.f32.mxu0 %vm211_vm2, %v1786_v27 }
 0xe94   :  { %3463 = vmatmul.mubr.msk.f32.vlgmr.msra.gmra.mrb[16].mxu0 %vm211_vm2, %v1787_v28 }
 0xe96   :  { %v1788_v29 = vld [vmem:[#allocation2 + $0x10] sm:$0xff] }
 0xe97   :  { %3465 = vmatprep.mubr.msk.f32.mxu0 %vm211_vm2, %v1788_v29 }
 0xe9a   :  { %v1789_v30 = vld [vmem:[#allocation2 + $0x18] sm:$0xff] }
 0xe9b   :  { %3466 = vmatmul.mubr.msk.f32.gmra.mrb[18].mxu0 %vm211_vm2, %v1789_v30 }
 0xe9c   :  { %3498 = vmatprep.mubr.msk.f32.mxu0 %vm745_vm5, %v4055_v50  ;;  %v1971_v50 = vrot.slane %v4206_v17, 5 }
 0xf67   :  { %v3464_v37 = vpop.f32.mrb[16].mxu0 }
 0xf68   :  { %v1887_v38 = vadd.f32 %v3464_v37, %v1802_v31  ;;  %v1881_v39 = vpop.f32.mrb[17].mxu0  ;;  %v3022_v37 = vld [vmem:[%s4438_s3 + $0x148] sm:$0xff] }
 0xf69   :  { %v1882_v40 = vadd.f32 %v1881_v39, %v1802_v31  ;;  %v3025_v39 = vld [vmem:[%s4438_s3 + $0x160] sm:$0xff] }
 0xf6b   :  { %v3726_v41 = vpack.c.bf16 %v1887_v38, %v1882_v40 }
 0xf6d   :  { %3727 = vmatpush3.bf16.msra.mxu1 %v3726_v41 }
 0xf6e   :  { %v3467_v42 = vpop.f32.mrb[18].mxu0  ;;  %3728 = vmatprep.subr.bf16.mxu1 %v3873_v32 }
 0xf6f   :  { %v1897_v43 = vadd.f32 %v3467_v42, %v1802_v31  ;;  %v1891_v44 = vpop.f32.mrb[19].mxu0  ;;  %v3027_v42 = vld [vmem:[%s4438_s3 + $0x170] sm:$0xff] }
 0xf70   :  { %v1892_v45 = vadd.f32 %v1891_v44, %v1802_v31  ;;  %v3021_v31 = vld [vmem:[%s4438_s3 + $0x140] sm:$0xff] }
 0xf72   :  { %v3729_v46 = vpack.c.bf16 %v1897_v43, %v1892_v45 }
 0xf74   :  { %3730 = vmatpush3.bf16.msra.mxu1 %v3729_v46 }
 0xf75   :  { %3731 = vmatprep.subr.bf16.mxu1 %v3873_v32 }
 0xf77   :  { %3477 = vmatmul.mubr.msk.f32.vlgmr.msra.gmra.mrb[32].mxu1 %vm745_vm5, %v3866_v9 }
 0xf78   :  { %3487 = vmatprep.mubr.msk.f32.mxu1 %vm3865_vm0, %v3864_v2 }
0x104a   :  { %v1966_v47 = vpop.f32.mrb[32].mxu1 }
0x104b   :  { %v1970_v48 = vmul.f32 0.03125, %v1966_v47  ;;  %v3478_v53 = vpop.f32.mrb[33].mxu1 }
0x104d   :  { %v1973_v54 = vmul.f32 %v1971_v50, %v1970_v48  ;;  %v4331_v48 = vld [vmem:[%s4439_s4 + $0x10] sm:$0x7f] }
0x104f   :  { %v1977_v55 = vrot.slane %v1973_v54, %v4040_v35 }
0x1051   :  { %v1978_v56 = vsub.f32 %v1882_v40, %v1977_v55  ;;  %v1979_v57 = vsub.f32 %v1887_v38, %v1977_v55  ;;  %v1980_v58 = vsub.f32 %v1892_v45, %v1977_v55  ;;  %v1981_v59 = vsub.f32 %v1897_v43, %v1977_v55  ;;  %v3026_v40 = vld [vmem:[%s4438_s3 + $0x168] sm:$0xff]  ;;  %v3028_v43 = vld [vmem:[%s4438_s3 + $0x178] sm:$0xff] }
0x1052   :  { %v3745_v38 = vpack.c.bf16 %v3022_v37, %v3021_v31  ;;  %v3753_v41 = vpack.c.bf16 %v3026_v40, %v3025_v39  ;;  %v3757_v44 = vpack.c.bf16 %v3028_v43, %v3027_v42  ;;  %v3037_v37 = vld [vmem:[%s4438_s3 + $0x190] sm:$0xff] }
0x1053   :  { %v1982_v60 = vmul.f32 %v1978_v56, %v1978_v56  ;;  %v1983_v61 = vmul.f32 %v1979_v57, %v1979_v57  ;;  %v1984_v0 = vmul.f32 %v1980_v58, %v1980_v58  ;;  %v1985_v36 = vmul.f32 %v1981_v59, %v1981_v59 }
0x1055   :  { %v3732_v62 = vpack.c.bf16 %v1983_v61, %v1982_v60  ;;  %v3735_v1 = vpack.c.bf16 %v1985_v36, %v1984_v0  ;;  %v2208_v61 = vrot.slane %v4206_v17, %v1394_v63  ;;  %v2378_v63 = vrot.slane %v4331_v48, 1 }
0x1057   :  { %3733 = vmatpush3.bf16.msra.mxu1 %v3732_v62 }
0x1058   :  { %3734 = vmatprep.subr.bf16.mxu1 %v3873_v32 }
0x105b   :  { %3736 = vmatpush3.bf16.msra.mxu1 %v3735_v1 }
0x105c   :  { %3746 = vmatprep.subr.bf16.mxu1 %v3745_v38 }
0x105e   :  { %3488 = vmatmul.mubr.msk.f32.vlgmr.msra.gmra.mrb[34].mxu1 %vm745_vm5, %v3866_v9 }
0x105f   :  { %3748 = vmatpush3.bf16.msra.mxu1 %v3745_v38  ;;  %v3038_v38 = vld [vmem:[%s4438_s3 + $0x198] sm:$0xff] }
0x1131   :  { %v2052_v4 = vpop.f32.mrb[34].mxu1 }
0x1132   :  { %v2056_v6 = vmul.f32 0.03125, %v2052_v4  ;;  %v3489_v7 = vpop.f32.mrb[35].mxu1 }
0x1134   :  { %v2057_v8 = vadd.f32 1e-05, %v2056_v6 }
0x1136   :  { %3831 = vrsqrt.f32 %v2057_v8 }
0x1140   :  { %v3832_v10 = vpop.eup %3831 }
0x1141   :  { %v2060_v11 = vrot.slane %v3832_v10, 5 }
0x1143   :  { %v2062_v12 = vmul.f32 %v2060_v11, %v4206_v17 }
0x1145   :  { %v2066_v15 = vrot.slane %v2062_v12, %v4133_v13 }
0x1147   :  { %v2067_v18 = vmul.f32 %v2066_v15, %v1978_v56  ;;  %v2068_v19 = vmul.f32 %v2066_v15, %v1979_v57  ;;  %v2069_v20 = vmul.f32 %v2066_v15, %v1980_v58  ;;  %v2070_v21 = vmul.f32 %v2066_v15, %v1981_v59 }
0x1149   :  { %v2075_v22 = vadd.f32 %v2074_v16, %v2067_v18  ;;  %v2076_v23 = vadd.f32 %v2074_v16, %v2068_v19  ;;  %v2077_v5 = vadd.f32 %v2074_v16, %v2069_v20  ;;  %v2078_v24 = vadd.f32 %v2074_v16, %v2070_v21 }
0x114b   :  { %v2079_v25 = vmax.f32 %v2075_v22, 0.0  ;;  %v2080_v26 = vmax.f32 %v2076_v23, 0.0  ;;  %v2081_v27 = vmax.f32 %v2077_v5, 0.0  ;;  %v2082_v28 = vmax.f32 %v2078_v24, 0.0 }
0x114d   :  { %v3737_v29 = vpack.c.bf16 %v2080_v26, %v2079_v25  ;;  %2168 = vst.msk [vmem:[#allocation2] sm:$0xff] %vm745_vm5, %v2079_v25  ;;  %2169 = vst.msk [vmem:[#allocation2 + $0x8] sm:$0xff] %vm745_vm5, %v2080_v26  ;;  %v3741_v30 = vpack.c.bf16 %v2082_v28, %v2081_v27 }
0x114e   :  { %2170 = vst.msk [vmem:[#allocation2 + $0x10] sm:$0xff] %vm745_vm5, %v2081_v27  ;;  %2171 = vst.msk [vmem:[#allocation2 + $0x18] sm:$0xff] %vm745_vm5, %v2082_v28 }
0x114f   :  { %3738 = vmatprep.subr.bf16.mxu0 %v3737_v29 }
0x1150   :  { %3740 = vmatpush3.bf16.msra.mxu0 %v3737_v29  ;;  %v3035_v29 = vld [vmem:[%s4438_s3 + $0x180] sm:$0xff] }
0x1151   :  { %3742 = vmatprep.subr.bf16.mxu0 %v3741_v30 }
0x1154   :  { %3744 = vmatpush3.bf16.msra.mxu0 %v3741_v30  ;;  %v3036_v30 = vld [vmem:[%s4438_s3 + $0x188] sm:$0xff] }
0x1155   :  { %3761 = vmatprep.subr.bf16.mxu0 %v3873_v32  ;;  %v3773_v31 = vpack.c.bf16 %v3036_v30, %v3035_v29 }
0x1157   :  { %3499 = vmatmul.mubr.msk.f32.vlgmr.msra.gmra.mrb[20].mxu0 %vm745_vm5, %v4053_v49  ;;  %v3023_v49 = vld [vmem:[%s4438_s3 + $0x150] sm:$0xff] }
0x1158   :  { %3501 = vmatprep.mubr.msk.f32.mxu0 %vm745_vm5, %v4061_v52 }
0x115b   :  { %3502 = vmatmul.mubr.msk.f32.gmra.mrb[22].mxu0 %vm745_vm5, %v4059_v51  ;;  %v3024_v51 = vld [vmem:[%s4438_s3 + $0x158] sm:$0xff] }
0x115c   :  { %3534 = vmatprep.mubr.msk.f32.mxu0 %vm3865_vm0, %v3864_v2  ;;  %v3749_v52 = vpack.c.bf16 %v3024_v51, %v3023_v49  ;;  %v3043_v49 = vld [vmem:[%s4438_s3 + $0x1c0] sm:$0xff]  ;;  %v3044_v51 = vld [vmem:[%s4438_s3 + $0x1c8] sm:$0xff] }
0x115e   :  { %3750 = vmatprep.subr.bf16.mxu1 %v3749_v52 }
0x115f   :  { %3752 = vmatpush3.bf16.msra.mxu1 %v3749_v52  ;;  %v3781_v52 = vpack.c.bf16 %v3044_v51, %v3043_v49 }
0x1160   :  { %3754 = vmatprep.subr.bf16.mxu1 %v3753_v41 }
0x1163   :  { %3756 = vmatpush3.bf16.msra.mxu1 %v3753_v41 }
0x1164   :  { %3758 = vmatprep.subr.bf16.mxu1 %v3757_v44 }
0x1167   :  { %3760 = vmatpush3.bf16.msra.mxu1 %v3757_v44 }
0x1168   :  { %3774 = vmatprep.subr.bf16.mxu1 %v3773_v31 }
0x122a   :  { %v3500_v45 = vpop.f32.mrb[20].mxu0 }
0x122b   :  { %2178 = vrot.lane.b32.xlu0 %v3500_v45, %s3872_s20  ;;  %v2149_v46 = vpop.f32.mrb[21].mxu0 }
0x122e   :  { %v3503_v50 = vpop.f32.mrb[22].mxu0 }
0x122f   :  { %2176 = vrot.lane.b32.xlu0 %v2149_v46, %s3872_s20  ;;  %v2159_v47 = vpop.f32.mrb[23].mxu0 }
0x1233   :  { %2180 = vrot.lane.b32.xlu0 %v2159_v47, %s3872_s20 }
0x1237   :  { %2182 = vrot.lane.b32.xlu0 %v3503_v50, %s3872_s20  ;;  %v2481_v50 = vrot.slane %v4331_v48, %v4040_v35 }
0x123b   :  { %2821 = vperm.xlu0 %3824, %v4331_v48  }
0x129d   :  { %v2179_v53 = vpop.permute.xlu0 %2178 }
0x129e   :  { %2189 = vst.msk [vmem:[#allocation2 + $0x8] sm:$0xff] %vm964_vm6, %v2179_v53 }
0x12a1   :  { %v2177_v54 = vpop.permute.xlu0 %2176 }
0x12a2   :  { %2188 = vst.msk [vmem:[#allocation2] sm:$0xff] %vm964_vm6, %v2177_v54 }
0x12a5   :  { %v2181_v55 = vpop.permute.xlu0 %2180  ;;  %v2193_v58 = vld [vmem:[#allocation2 + $0x8] sm:$0xff] }
0x12a6   :  { %2190 = vst.msk [vmem:[#allocation2 + $0x10] sm:$0xff] %vm964_vm6, %v2181_v55 }
0x12a9   :  { %v2183_v56 = vpop.permute.xlu0 %2182  ;;  %v2192_v57 = vld [vmem:[#allocation2] sm:$0xff] }
0x12aa   :  { %2191 = vst.msk [vmem:[#allocation2 + $0x18] sm:$0xff] %vm964_vm6, %v2183_v56  ;;  %3520 = vmatprep.mubr.msk.f32.mxu1 %vm211_vm2, %v2192_v57 }
0x12ab   :  { %3521 = vmatmul.mubr.msk.f32.vlgmr.msra.gmra.mrb[36].mxu1 %vm211_vm2, %v2193_v58 }
0x12ac   :  { %3776 = vmatpush3.bf16.msra.mxu1 %v3773_v31 }
0x12ad   :  { %v2194_v59 = vld [vmem:[#allocation2 + $0x10] sm:$0xff] }
0x12ae   :  { %3523 = vmatprep.mubr.msk.f32.mxu1 %vm211_vm2, %v2194_v59 }
0x12b1   :  { %v2195_v60 = vld [vmem:[#allocation2 + $0x18] sm:$0xff] }
0x12b2   :  { %3524 = vmatmul.mubr.msk.f32.gmra.mrb[38].mxu1 %vm211_vm2, %v2195_v60 }
0x137e   :  { %v3522_v62 = vpop.f32.mrb[36].mxu1 }
0x137f   :  { %v2293_v0 = vadd.f32 %v3522_v62, %v2208_v61  ;;  %v2287_v36 = vpop.f32.mrb[37].mxu1 }
0x1380   :  { %v2288_v1 = vadd.f32 %v2287_v36, %v2208_v61  ;;  %v3052_v36 = vld [vmem:[%s4438_s3 + $0x208] sm:$0xff] }
0x1382   :  { %v3762_v4 = vpack.c.bf16 %v2293_v0, %v2288_v1 }
0x1384   :  { %3763 = vmatpush3.bf16.msra.mxu0 %v3762_v4  ;;  %v2498_v4 = vrot.slane %v4331_v48, %v4117_v33  ;;  %v3053_v33 = vld [vmem:[%s4438_s3 + $0x210] sm:$0xff] }
0x1385   :  { %v3525_v6 = vpop.f32.mrb[38].mxu1  ;;  %3764 = vmatprep.subr.bf16.mxu0 %v3873_v32 }
0x1386   :  { %v2303_v7 = vadd.f32 %v3525_v6, %v2208_v61  ;;  %v2297_v8 = vpop.f32.mrb[39].mxu1 }
0x1387   :  { %v2298_v10 = vadd.f32 %v2297_v8, %v2208_v61 }
0x1389   :  { %v3765_v11 = vpack.c.bf16 %v2303_v7, %v2298_v10 }
0x138b   :  { %3766 = vmatpush3.bf16.msra.mxu0 %v3765_v11 }
0x138c   :  { %3767 = vmatprep.subr.bf16.mxu0 %v3873_v32 }
0x138e   :  { %3535 = vmatmul.mubr.msk.f32.vlgmr.msra.gmra.mrb[24].mxu0 %vm745_vm5, %v3866_v9 }
0x138f   :  { %3545 = vmatprep.mubr.msk.f32.mxu0 %vm3865_vm0, %v3864_v2 }
0x1461   :  { %v2372_v12 = vpop.f32.mrb[24].mxu0 }
0x1462   :  { %v2376_v15 = vmul.f32 0.03125, %v2372_v12  ;;  %v3536_v16 = vpop.f32.mrb[25].mxu0 }
0x1464   :  { %v2380_v18 = vmul.f32 %v2378_v63, %v2376_v15 }
0x1466   :  { %v2384_v19 = vrot.slane %v2380_v18, %v4040_v35  ;;  %v3045_v35 = vld [vmem:[%s4438_s3 + $0x1d0] sm:$0xff] }
0x1468   :  { %v2385_v20 = vsub.f32 %v2288_v1, %v2384_v19  ;;  %v2386_v21 = vsub.f32 %v2293_v0, %v2384_v19  ;;  %v2387_v22 = vsub.f32 %v2298_v10, %v2384_v19  ;;  %v2388_v23 = vsub.f32 %v2303_v7, %v2384_v19  ;;  %v3051_v0 = vld [vmem:[%s4438_s3 + $0x200] sm:$0xff] }
0x1469   :  { %v3789_v1 = vpack.c.bf16 %v3052_v36, %v3051_v0 }
0x146a   :  { %v2389_v5 = vmul.f32 %v2385_v20, %v2385_v20  ;;  %v2390_v24 = vmul.f32 %v2386_v21, %v2386_v21  ;;  %v2391_v26 = vmul.f32 %v2387_v22, %v2387_v22  ;;  %v2392_v27 = vmul.f32 %v2388_v23, %v2388_v23 }
0x146c   :  { %v3768_v25 = vpack.c.bf16 %v2390_v24, %v2389_v5  ;;  %v3771_v28 = vpack.c.bf16 %v2392_v27, %v2391_v26 }
0x146e   :  { %3769 = vmatpush3.bf16.msra.mxu0 %v3768_v25 }
0x146f   :  { %3770 = vmatprep.subr.bf16.mxu0 %v3873_v32 }
0x1472   :  { %3772 = vmatpush3.bf16.msra.mxu0 %v3771_v28 }
0x1473   :  { %3782 = vmatprep.subr.bf16.mxu0 %v3781_v52 }
0x1475   :  { %3546 = vmatmul.mubr.msk.f32.vlgmr.msra.gmra.mrb[26].mxu0 %vm745_vm5, %v3866_v9  ;;  %v3777_v9 = vpack.c.bf16 %v3038_v38, %v3037_v37 }
0x1476   :  { %3784 = vmatpush3.bf16.msra.mxu0 %v3781_v52 }
0x1477   :  { %3778 = vmatprep.subr.bf16.mxu1 %v3777_v9 }
0x1478   :  { %3780 = vmatpush3.bf16.msra.mxu1 %v3777_v9 }
0x1479   :  { %3790 = vmatprep.subr.bf16.mxu1 %v3789_v1 }
0x1548   :  { %v2459_v39 = vpop.f32.mrb[26].mxu0 }
0x1549   :  { %v2463_v40 = vmul.f32 0.03125, %v2459_v39  ;;  %v3547_v41 = vpop.f32.mrb[27].mxu0 }
0x154b   :  { %v2464_v42 = vadd.f32 1e-05, %v2463_v40 }
0x154d   :  { %3833 = vrsqrt.f32 %v2464_v42 }
0x1557   :  { %v3834_v43 = vpop.eup %3833 }
0x1558   :  { %v2467_v44 = vrot.slane %v3834_v43, 1 }
0x155a   :  { %v2469_v45 = vmul.f32 %v2467_v44, %v4206_v17  ;;  %v3046_v17 = vld [vmem:[%s4438_s3 + $0x1d8] sm:$0xff] }
0x155c   :  { %v2473_v46 = vrot.slane %v2469_v45, %v1659_v3  ;;  %v3785_v3 = vpack.c.bf16 %v3046_v17, %v3045_v35 }
0x155e   :  { %v2475_v47 = vmul.f32 %v2473_v46, %v2386_v21  ;;  %v2474_v53 = vmul.f32 %v2473_v46, %v2385_v20  ;;  %v2476_v54 = vmul.f32 %v2473_v46, %v2387_v22  ;;  %v2477_v55 = vmul.f32 %v2473_v46, %v2388_v23  ;;  %3786 = vmatprep.subr.bf16.mxu0 %v3785_v3  ;;  %v3054_v21 = vld [vmem:[%s4438_s3 + $0x218] sm:$0xff]  ;;  %s3874_s3 = smov [#allocation3]  }
0x155f   :  { %3788 = vmatpush3.bf16.msra.mxu0 %v3785_v3  ;;  %v3793_v22 = vpack.c.bf16 %v3054_v21, %v3053_v33  ;;  %v2608_v23 = vrot.slane %v4331_v48, %v4133_v13  ;;  %v2718_v13 = vrot.slane %v4331_v48, %v4136_v14  ;;  %s2924_s15 = sshll.u32 %s3874_s3, 4  ;;  %s2925_s15 = int_to_ptr.vmem [resolvable:$true] %s2924_s15 }
0x1560   :  { %v2482_v56 = vadd.f32 %v2481_v50, %v2474_v53  ;;  %v2483_v57 = vadd.f32 %v2481_v50, %v2475_v47  ;;  %v2484_v58 = vadd.f32 %v2481_v50, %v2476_v54  ;;  %v2485_v61 = vadd.f32 %v2481_v50, %v2477_v55  ;;  %3797 = vmatprep.subr.bf16.mxu0 %v3873_v32  ;;  %v2822_v53 = vpop.permute.xlu0 %2821  ;;  %s3839_s16 = scalar_lea.vmem %s2925_s15, 16  ;;  %s3843_s17 = scalar_lea.vmem %s2925_s15, 32 }
0x1561   :  { %v2823_v47 = vrot.slane %v4331_v48, 6  ;;  %v2824_v54 = vrot.slane %v2822_v53, 5  ;;  %p3840_p0 = scmp.ne.s32.totalorder %s2925_s15, %s3839_s16  ;;  %p3844_p1 = scmp.lt.s32.totalorder %s2925_s15, %s2925_s15 }
0x1562   :  { %v2486_v59 = vmax.f32 %v2482_v56, 0.0  ;;  %v2487_v60 = vmax.f32 %v2483_v57, 0.0  ;;  %v2488_v62 = vmax.f32 %v2484_v58, 0.0  ;;  %v2489_v34 = vmax.f32 %v2485_v61, 0.0  ;;  %p3845_p2 = scmp.lt.s32.totalorder %s3843_s17, %s3839_s16 }
0x1564   :  { %3556 = vmatprep.mubr.msk.f32.mxu1 %vm745_vm5, %v2486_v59  ;;  %p3846_p3 = por %p3845_p2, %p3844_p1 }
0x1565   :  { %3557 = vmatmul.mubr.msk.f32.vlgmr.msra.gmra.mrb[40].mxu1 %vm745_vm5, %v2487_v60 }
0x1566   :  { %3559 = vmatprep.mubr.msk.f32.mxu1 %vm745_vm5, %v2488_v62  ;;  %3792 = vmatpush3.bf16.msra.mxu1 %v3789_v1  ;;  %p3847_p4 = pnand %p3846_p3, %p3840_p0 }
0x1567   :  { %3794 = vmatprep.subr.bf16.mxu1 %v3793_v22 }
0x1569   :  { %3560 = vmatmul.mubr.msk.f32.gmra.mrb[42].mxu1 %vm745_vm5, %v2489_v34 }
0x156a   :  { %3796 = vmatpush3.bf16.msra.mxu1 %v3793_v22 }
0x1638   :  { %v3558_v6 = vpop.f32.mrb[40].mxu1 }
0x1639   :  { %v2583_v7 = vadd.f32 %v3558_v6, %v2498_v4  ;;  %v2577_v8 = vpop.f32.mrb[41].mxu1 }
0x163a   :  { %v2578_v10 = vadd.f32 %v2577_v8, %v2498_v4 }
0x163b   :  { %v2597_v12 = vmax.f32 %v2583_v7, 0.0 }
0x163c   :  { %v2596_v11 = vmax.f32 %v2578_v10, 0.0  ;;  %v3561_v63 = vpop.f32.mrb[42].mxu1 }
0x163d   :  { %v2593_v15 = vadd.f32 %v3561_v63, %v2498_v4  ;;  %v2587_v16 = vpop.f32.mrb[43].mxu1 }
0x163e   :  { %v2588_v18 = vadd.f32 %v2587_v16, %v2498_v4  ;;  %3570 = vmatprep.mubr.msk.f32.mxu0 %vm745_vm5, %v2596_v11 }
0x163f   :  { %3571 = vmatmul.mubr.msk.f32.vlgmr.msra.gmra.mrb[28].mxu0 %vm745_vm5, %v2597_v12  ;;  %v2599_v20 = vmax.f32 %v2593_v15, 0.0 }
0x1640   :  { %v2598_v19 = vmax.f32 %v2588_v18, 0.0 }
0x1642   :  { %3573 = vmatprep.mubr.msk.f32.mxu0 %vm745_vm5, %v2598_v19 }
0x1643   :  { %3574 = vmatmul.mubr.msk.f32.gmra.mrb[30].mxu0 %vm745_vm5, %v2599_v20 }
0x1644   :  { %3598 = vmatprep.mubr.msk.f32.mxu0 %vm3865_vm0, %v3864_v2  ;;  %vm3799_vm0 = vmpackc.low %vm745_vm5, %vm745_vm5 }
0x1712   :  { %v3572_v5 = vpop.f32.mrb[28].mxu0 }
0x1713   :  { %v2693_v24 = vadd.f32 %v3572_v5, %v2608_v23  ;;  %v2687_v25 = vpop.f32.mrb[29].mxu0 }
0x1714   :  { %v2688_v26 = vadd.f32 %v2687_v25, %v2608_v23 }
0x1715   :  { %v2707_v28 = vmax.f32 %v2693_v24, 0.0 }
0x1716   :  { %v2706_v27 = vmax.f32 %v2688_v26, 0.0  ;;  %v3575_v2 = vpop.f32.mrb[30].mxu0 }
0x1717   :  { %v2703_v29 = vadd.f32 %v3575_v2, %v2608_v23  ;;  %v2697_v30 = vpop.f32.mrb[31].mxu0 }
0x1718   :  { %v2698_v31 = vadd.f32 %v2697_v30, %v2608_v23  ;;  %3584 = vmatprep.mubr.msk.f32.mxu1 %vm745_vm5, %v2706_v27 }
0x1719   :  { %3585 = vmatmul.mubr.msk.f32.vlgmr.msra.gmra.mrb[44].mxu1 %vm745_vm5, %v2707_v28  ;;  %v2709_v38 = vmax.f32 %v2703_v29, 0.0 }
0x171a   :  { %v2708_v37 = vmax.f32 %v2698_v31, 0.0 }
0x171c   :  { %3587 = vmatprep.mubr.msk.f32.mxu1 %vm745_vm5, %v2708_v37 }
0x171d   :  { %3588 = vmatmul.mubr.msk.f32.gmra.mrb[46].mxu1 %vm745_vm5, %v2709_v38 }
0x17ec   :  { %v3586_v9 = vpop.f32.mrb[44].mxu1 }
0x17ed   :  { %v2803_v49 = vadd.f32 %v3586_v9, %v2718_v13  ;;  %v2797_v51 = vpop.f32.mrb[45].mxu1 }
0x17ee   :  { %v2798_v52 = vadd.f32 %v2797_v51, %v2718_v13 }
0x17ef   :  { %v2817_v39 = vmax.f32 %v2803_v49, 0.0 }
0x17f0   :  { %v2816_v40 = vmax.f32 %v2798_v52, 0.0  ;;  %v3589_v41 = vpop.f32.mrb[46].mxu1 }
0x17f1   :  { %v2813_v42 = vadd.f32 %v3589_v41, %v2718_v13  ;;  %v2807_v43 = vpop.f32.mrb[47].mxu1 }
0x17f2   :  { %v3798_v44 = vpack.c.bf16 %v2817_v39, %v2816_v40  ;;  %v2808_v45 = vadd.f32 %v2807_v43, %v2718_v13 }
0x17f3   :  { %v2819_v46 = vmax.f32 %v2813_v42, 0.0 }
0x17f4   :  { %v2818_v50 = vmax.f32 %v2808_v45, 0.0  ;;  %3800 = vmatpush3.bf16.xpose.msk.msra.mxu0 %vm3799_vm0, %v3798_v44 }
0x17f5   :  { %3801 = vmatprep.subr.bf16.mxu0 %v3873_v32 }
0x17f6   :  { %v3802_v14 = vpack.c.bf16 %v2819_v46, %v2818_v50 }
0x17fc   :  { %3804 = vmatpush3.bf16.xpose.msk.msra.mxu0 %vm3799_vm0, %v3802_v14 }
0x1803   :  { %3599 = vmatmul.mubr.msk.f32.vlgmr.msra.gmra.mrb[32].mxu0 %vm745_vm5, %v2823_v47 }
0x18d6   :  { %v2906_v55 = vpop.f32.mrb[32].mxu0 }
0x18d7   :  { %v2907_v56 = vadd.f32 %v2906_v55, %v2824_v54  ;;  %v3600_v57 = vpop.f32.mrb[33].mxu0 }
0x18d9   :  { %v3064_v58 = vmul.f32 -1.442695, %v2907_v56 }
0x18db   :  { %3835 = vpow2.f32 %v3064_v58 }
0x18e5   :  { %v3836_v59 = vpop.eup %3835 }
0x18e6   :  { %v2913_v60 = vadd.f32 1.0, %v3836_v59 }
0x18e8   :  { %3837 = vrcp.f32 %v2913_v60 }
0x18f2   :  { %v3838_v32 = vpop.eup %3837 }
0x18f3   :  { %2917 = vst.msk [vmem:[#allocation3] sm:$0x1] %vm2916_vm7, %v3838_v32 }
0x18f4   :  { %3850 = shalt.err (!%p3847_p4)
}
0x18f5   :  { %s3851_s4 = scalar_lea.hbm %s4440_s5, 16 }
0x18f6   :  { %p3852_p5 = scmp.ne.s32.totalorder %s4440_s5, %s3851_s4  ;;  %p3855_p6 = scmp.lt.u32.totalorder %s3851_s4, %s4440_s5 }
0x18f8   :  { %p3857_p7 = pnand %p3855_p6, %p3852_p5 }
0x18fa   :  { %3860 = shalt.err (!%p3857_p7)
}
0x18fb   :  { %2927 = dma.vmem_to_hbm [thread:$0]  %s2925_s15, 16, %s4440_s5, [#allocation4]  }
0x18fc   :  { %3861 = dma.done.wait [#allocation4], 16  }
0x18fd   :  { %3862 = vsyncadd [#allocation4], 4294967280 }
0x18fe   :  { %2931 = vsyncpa [#allocation4], 1 }

</bundles_post_ra>
